<compile_context>
chip_gen: v7x
topology: tpu7x:2x2x1
jax: 0.10.0
libtpu: 0.0.40
codegen_flags: <defaults>
</compile_context>

<pallas_src>
import jax
import jax.numpy as jnp
import numpy as np
from jax import lax
from jax.experimental import pallas as pl
from jax.experimental.pallas import tpu as pltpu


def _decoder_kernel(
    dts_ref,                            # SMEM: (n_steps,) per-step dt
    data_ref,                           # VMEM: (n_steps, t_pad, n_dims) time-major data
    w_h_zr_ref, w_x_zr_ref, b_zr_ref,   # fused update|reset gate weights
    w_h_n_ref, w_x_n_ref, b_n_ref,      # new-state net
    w_o_ref, b_o_ref,                   # ode_func (Euler step)
    w_e_ref, b_e_ref,                   # infer_emitter_z
    ys_ref,                             # out: (n_steps, t_pad, C) probs
    st_ref,                             # out: (n_steps, t_pad, L) states
    xzr_scr,                            # scratch: (n_steps, t_pad, 2L) x-projections (z|r)
    xn_scr,                             # scratch: (n_steps, t_pad, L)  x-projections (n)
):
    n_steps, t_pad, n_dims = data_ref.shape
    latent = w_o_ref.shape[0]
    clusters = w_e_ref.shape[1]

    # ---- loop-invariant work, hoisted off the serial recurrence -------------
    # All x-dependent projections (and their biases) are independent of h, so
    # compute them for every time step at once with two wide matmuls.
    x_all = data_ref[...].reshape(n_steps * t_pad, n_dims)
    xzr_scr[...] = (
        jnp.dot(x_all, w_x_zr_ref[...], preferred_element_type=jnp.float32)
        + b_zr_ref[...]
    ).reshape(n_steps, t_pad, 2 * latent)
    xn_scr[...] = (
        jnp.dot(x_all, w_x_n_ref[...], preferred_element_type=jnp.float32)
        + b_n_ref[...]
    ).reshape(n_steps, t_pad, latent)

    # Hoist weight loads and bias broadcasts out of the loop (no per-iteration
    # broadcast_in_dim).
    w_h_zr = w_h_zr_ref[...]
    w_h_n = w_h_n_ref[...]
    w_o = w_o_ref[...]
    w_e = w_e_ref[...]
    b_o = jnp.broadcast_to(b_o_ref[...], (t_pad, latent))
    b_e = jnp.broadcast_to(b_e_ref[...], (t_pad, clusters))

    def step(i, h):
        # GRU_unit_cluster: update & reset gates fused into a single dot.
        zr = jax.nn.sigmoid(
            jnp.dot(h, w_h_zr, preferred_element_type=jnp.float32) + xzr_scr[i]
        )
        z = zr[:, :latent]
        r = zr[:, latent:]
        n = jnp.dot(h * r, w_h_n, preferred_element_type=jnp.float32) + xn_scr[i]
        y = (1.0 - z) * n + z * h                       # yi_ode

        # Explicit-Euler ODE step: h_new = yi_ode + ode_func(yi_ode) * dt
        dt = dts_ref[i]
        h_new = y + jnp.tanh(
            jnp.dot(y, w_o, preferred_element_type=jnp.float32) + b_o
        ) * dt

        # emit_probs: softmax(infer_emitter_z(h_new), -1) with EUP reciprocal.
        logits = jnp.dot(h_new, w_e, preferred_element_type=jnp.float32) + b_e
        m = jnp.max(logits, axis=-1, keepdims=True)
        e = jnp.exp(logits - m)
        p = e * pl.reciprocal(jnp.sum(e, axis=-1, keepdims=True), approx=True)

        ys_ref[i] = p
        st_ref[i] = h_new
        return h_new

    h0 = jnp.zeros((t_pad, latent), jnp.float32)
    # Small, static trip count -> fully unroll for LLO scheduler visibility.
    lax.fori_loop(0, n_steps, step, h0, unroll=True)


def decoder_ode_rnn_cluster_forward(data, time_steps, params):
    """data: (n_traj, n_tp, n_dims) f32; time_steps: (n_tp,) f32."""
    n_traj, n_tp, n_dims = data.shape
    L = params["wzh"].shape[0]
    C = params["we"].shape[1]
    n_steps = n_tp - 1
    t_pad = ((n_traj + 7) // 8) * 8     # pad trajectories to the f32 sublane tile

    # Time-major, only the first n_steps slices are consumed; zero-pad traj dim.
    data_tm = jnp.transpose(data, (1, 0, 2))[:n_steps]
    data_tm = jnp.pad(data_tm, ((0, 0), (0, t_pad - n_traj), (0, 0)))

    dts = (time_steps[1:] - time_steps[:-1]).astype(jnp.float32)

    # Fuse update/reset gates along the output dim; keep h-weights and
    # x-weights separate so the x projections can be hoisted inside the kernel.
    w_h_zr = jnp.concatenate([params["wzh"], params["wrh"]], axis=1)   # (L, 2L)
    w_x_zr = jnp.concatenate([params["wzx"], params["wrx"]], axis=1)   # (D, 2L)
    b_zr = jnp.concatenate([params["bz"], params["br"]], axis=1)       # (1, 2L)
    # TODO(synk): on v6e/v7x the weights/activations could be cast to bf16
    # (keeping f32 accumulation) to halve DMA bytes; kept f32 here for exact
    # parity with the f32 reference.

    vmem = pl.BlockSpec(memory_space=pltpu.MemorySpace.VMEM)
    smem = pl.BlockSpec(memory_space=pltpu.MemorySpace.SMEM)

    ys, states = pl.pallas_call(
        _decoder_kernel,
        out_shape=(
            jax.ShapeDtypeStruct((n_steps, t_pad, C), jnp.float32),
            jax.ShapeDtypeStruct((n_steps, t_pad, L), jnp.float32),
        ),
        in_specs=[smem] + [vmem] * 11,
        out_specs=(vmem, vmem),
        scratch_shapes=[
            pltpu.VMEM((n_steps, t_pad, 2 * L), jnp.float32),
            pltpu.VMEM((n_steps, t_pad, L), jnp.float32),
        ],
    )(
        dts, data_tm,
        w_h_zr, w_x_zr, b_zr,
        params["wnh"], params["wnx"], params["bn"],
        params["wo"], params["bo"],
        params["we"], params["be"],
    )

    # Match torch.stack(list of (1, n_traj, .), dim=1) -> (1, n_tp-1, n_traj, .)
    latent_ys = ys[:, :n_traj, :][None]
    latent_y_states = states[:, :n_traj, :][None]
    return latent_ys, latent_y_states


def _reference_forward(data, time_steps, params):
    """Pure-JAX reference with identical semantics (exact softmax divide)."""
    n_traj, n_tp, n_dims = data.shape
    L = params["wzh"].shape[0]
    h = jnp.zeros((n_traj, L), jnp.float32)
    ys, sts = [], []
    for i in range(n_tp - 1):
        x = data[:, i, :]
        z = jax.nn.sigmoid(h @ params["wzh"] + x @ params["wzx"] + params["bz"])
        r = jax.nn.sigmoid(h @ params["wrh"] + x @ params["wrx"] + params["br"])
        n = (h * r) @ params["wnh"] + x @ params["wnx"] + params["bn"]
        y = (1.0 - z) * n + z * h
        dt = time_steps[i + 1] - time_steps[i]
        h = y + jnp.tanh(y @ params["wo"] + params["bo"]) * dt
        logits = h @ params["we"] + params["be"]
        ys.append(jax.nn.softmax(logits, axis=-1))
        sts.append(h)
    return jnp.stack(ys, 0)[None], jnp.stack(sts, 0)[None]


def _init_params(key, latent_dim, input_dim, cluster_num):
    ks = jax.random.split(key, 10)
    s = 0.1
    return {
        "wzh": s * jax.random.normal(ks[0], (latent_dim, latent_dim), jnp.float32),
        "wzx": s * jax.random.normal(ks[1], (input_dim, latent_dim), jnp.float32),
        "bz": s * jax.random.normal(ks[2], (1, latent_dim), jnp.float32),
        "wrh": s * jax.random.normal(ks[3], (latent_dim, latent_dim), jnp.float32),
        "wrx": s * jax.random.normal(ks[4], (input_dim, latent_dim), jnp.float32),
        "br": s * jax.random.normal(ks[5], (1, latent_dim), jnp.float32),
        "wnh": s * jax.random.normal(ks[6], (latent_dim, latent_dim), jnp.float32),
        "wnx": s * jax.random.normal(ks[7], (input_dim, latent_dim), jnp.float32),
        "bn": s * jax.random.normal(ks[8], (1, latent_dim), jnp.float32),
        "wo": s * jax.random.normal(jax.random.fold_in(key, 100),
                                    (latent_dim, latent_dim), jnp.float32),
        "bo": s * jax.random.normal(jax.random.fold_in(key, 101),
                                    (1, latent_dim), jnp.float32),
        "we": s * jax.random.normal(jax.random.fold_in(key, 102),
                                    (latent_dim, cluster_num), jnp.float32),
        "be": s * jax.random.normal(jax.random.fold_in(key, 103),
                                    (1, cluster_num), jnp.float32),
    }


if __name__ == "__main__":
    latent_dim = 32     # self.latent_dim
    input_dim = 8       # n_dims of data
    cluster_num = 6     # self.cluster_num
    n_traj = 4
    n_tp = 8

    key = jax.random.PRNGKey(0)
    k_data, k_params = jax.random.split(key)

    data = jax.random.normal(k_data, (n_traj, n_tp, input_dim), jnp.float32)
    time_steps = jnp.linspace(0.0, 1.0, n_tp).astype(jnp.float32)
    params = _init_params(k_params, latent_dim, input_dim, cluster_num)

    latent_ys, latent_y_states = decoder_ode_rnn_cluster_forward(
        data, time_steps, params
    )
    jax.block_until_ready((latent_ys, latent_y_states))

    ref_ys, ref_states = _reference_forward(data, time_steps, params)
    # States are bit-close f32; probs use the EUP approximate reciprocal, so
    # allow a slightly looser tolerance there.
    np.testing.assert_allclose(np.asarray(latent_y_states), np.asarray(ref_states),
                               rtol=1e-4, atol=1e-5)
    np.testing.assert_allclose(np.asarray(latent_ys), np.asarray(ref_ys),
                               rtol=2e-2, atol=2e-3)

    assert latent_ys.shape == (1, n_tp - 1, n_traj, cluster_num)
    assert latent_y_states.shape == (1, n_tp - 1, n_traj, latent_dim)
    print("KERNEL_OK")
</pallas_src>

<mosaic_0001>
module attributes {stable_mosaic.version = 11 : i64} {
  func.func @_decoder_kernel(%arg0: memref<7xf32, #tpu.memory_space<smem>>, %arg1: memref<7x8x8xf32, #tpu.memory_space<vmem>>, %arg2: memref<32x64xf32, #tpu.memory_space<vmem>>, %arg3: memref<8x64xf32, #tpu.memory_space<vmem>>, %arg4: memref<1x64xf32, #tpu.memory_space<vmem>>, %arg5: memref<32x32xf32, #tpu.memory_space<vmem>>, %arg6: memref<8x32xf32, #tpu.memory_space<vmem>>, %arg7: memref<1x32xf32, #tpu.memory_space<vmem>>, %arg8: memref<32x32xf32, #tpu.memory_space<vmem>>, %arg9: memref<1x32xf32, #tpu.memory_space<vmem>>, %arg10: memref<32x6xf32, #tpu.memory_space<vmem>>, %arg11: memref<1x6xf32, #tpu.memory_space<vmem>>, %arg12: memref<7x8x6xf32, #tpu.memory_space<vmem>>, %arg13: memref<7x8x32xf32, #tpu.memory_space<vmem>>, %arg14: memref<7x8x64xf32, #tpu.memory_space<vmem>>, %arg15: memref<7x8x32xf32, #tpu.memory_space<vmem>>) attributes {dimension_semantics = [], scalar_prefetch = 0 : i64, scratch_operands = 2 : i64, tpu.core_type = #tpu.core_type<tc>} {
    %c0 = arith.constant 0 : index
    %c0_0 = arith.constant 0 : index
    %c0_1 = arith.constant 0 : index
    %0 = vector.load %arg1[%c0, %c0_0, %c0_1] : memref<7x8x8xf32, #tpu.memory_space<vmem>>, vector<7x8x8xf32>
    %1 = vector.shape_cast %0 : vector<7x8x8xf32> to vector<56x8xf32>
    %c0_2 = arith.constant 0 : index
    %c0_3 = arith.constant 0 : index
    %2 = vector.load %arg3[%c0_2, %c0_3] : memref<8x64xf32, #tpu.memory_space<vmem>>, vector<8x64xf32>
    %cst = arith.constant dense<0.000000e+00> : vector<56x64xf32>
    %3 = tpu.matmul %1, %2, %cst {dimension_numbers = #tpu.dot_dimension_numbers<[1], [0], [0], [1], [0, 0, 1, 1], [], []>} : vector<56x8xf32>, vector<8x64xf32>, vector<56x64xf32> -> vector<56x64xf32>
    %c0_4 = arith.constant 0 : index
    %c0_5 = arith.constant 0 : index
    %4 = vector.load %arg4[%c0_4, %c0_5] : memref<1x64xf32, #tpu.memory_space<vmem>>, vector<1x64xf32>
    %5 = vector.broadcast %4 : vector<1x64xf32> to vector<56x64xf32>
    %6 = arith.addf %3, %5 : vector<56x64xf32>
    %7 = vector.shape_cast %6 : vector<56x64xf32> to vector<7x8x64xf32>
    %c0_6 = arith.constant 0 : index
    %c0_7 = arith.constant 0 : index
    %c0_8 = arith.constant 0 : index
    %8 = vector.load %arg14[%c0_6, %c0_7, %c0_8] : memref<7x8x64xf32, #tpu.memory_space<vmem>>, vector<7x8x64xf32>
    tpu.vector_store %arg14[%c0_6, %c0_7, %c0_8], %7 {strides = array<i32>} : memref<7x8x64xf32, #tpu.memory_space<vmem>>, vector<7x8x64xf32>,
    %c0_9 = arith.constant 0 : index
    %c0_10 = arith.constant 0 : index
    %9 = vector.load %arg6[%c0_9, %c0_10] : memref<8x32xf32, #tpu.memory_space<vmem>>, vector<8x32xf32>
    %cst_11 = arith.constant dense<0.000000e+00> : vector<56x32xf32>
    %10 = tpu.matmul %1, %9, %cst_11 {dimension_numbers = #tpu.dot_dimension_numbers<[1], [0], [0], [1], [0, 0, 1, 1], [], []>} : vector<56x8xf32>, vector<8x32xf32>, vector<56x32xf32> -> vector<56x32xf32>
    %c0_12 = arith.constant 0 : index
    %c0_13 = arith.constant 0 : index
    %11 = vector.load %arg7[%c0_12, %c0_13] : memref<1x32xf32, #tpu.memory_space<vmem>>, vector<1x32xf32>
    %12 = vector.broadcast %11 : vector<1x32xf32> to vector<56x32xf32>
    %13 = arith.addf %10, %12 : vector<56x32xf32>
    %14 = vector.shape_cast %13 : vector<56x32xf32> to vector<7x8x32xf32>
    %c0_14 = arith.constant 0 : index
    %c0_15 = arith.constant 0 : index
    %c0_16 = arith.constant 0 : index
    %15 = vector.load %arg15[%c0_14, %c0_15, %c0_16] : memref<7x8x32xf32, #tpu.memory_space<vmem>>, vector<7x8x32xf32>
    tpu.vector_store %arg15[%c0_14, %c0_15, %c0_16], %14 {strides = array<i32>} : memref<7x8x32xf32, #tpu.memory_space<vmem>>, vector<7x8x32xf32>,
    %c0_17 = arith.constant 0 : index
    %c0_18 = arith.constant 0 : index
    %16 = vector.load %arg2[%c0_17, %c0_18] : memref<32x64xf32, #tpu.memory_space<vmem>>, vector<32x64xf32>
    %c0_19 = arith.constant 0 : index
    %c0_20 = arith.constant 0 : index
    %17 = vector.load %arg5[%c0_19, %c0_20] : memref<32x32xf32, #tpu.memory_space<vmem>>, vector<32x32xf32>
    %c0_21 = arith.constant 0 : index
    %c0_22 = arith.constant 0 : index
    %18 = vector.load %arg8[%c0_21, %c0_22] : memref<32x32xf32, #tpu.memory_space<vmem>>, vector<32x32xf32>
    %c0_23 = arith.constant 0 : index
    %c0_24 = arith.constant 0 : index
    %19 = vector.load %arg10[%c0_23, %c0_24] : memref<32x6xf32, #tpu.memory_space<vmem>>, vector<32x6xf32>
    %c0_25 = arith.constant 0 : index
    %c0_26 = arith.constant 0 : index
    %20 = vector.load %arg9[%c0_25, %c0_26] : memref<1x32xf32, #tpu.memory_space<vmem>>, vector<1x32xf32>
    %21 = vector.shape_cast %20 : vector<1x32xf32> to vector<1x32xf32>
    %22 = vector.broadcast %21 : vector<1x32xf32> to vector<8x32xf32>
    %c0_27 = arith.constant 0 : index
    %c0_28 = arith.constant 0 : index
    %23 = vector.load %arg11[%c0_27, %c0_28] : memref<1x6xf32, #tpu.memory_space<vmem>>, vector<1x6xf32>
    %24 = vector.shape_cast %23 : vector<1x6xf32> to vector<1x6xf32>
    %25 = vector.broadcast %24 : vector<1x6xf32> to vector<8x6xf32>
    %cst_29 = arith.constant 0.000000e+00 : f32
    %26 = vector.broadcast %cst_29 : f32 to vector<8x32xf32>
    %c0_i32 = arith.constant 0 : i32
    %cst_30 = arith.constant dense<0.000000e+00> : vector<8x64xf32>
    %27 = tpu.matmul %26, %16, %cst_30 {dimension_numbers = #tpu.dot_dimension_numbers<[1], [0], [0], [1], [0, 0, 1, 1], [], []>} : vector<8x32xf32>, vector<32x64xf32>, vector<8x64xf32> -> vector<8x64xf32>
    %28 = arith.index_cast %c0_i32 : i32 to index
    %c0_31 = arith.constant 0 : index
    %c0_32 = arith.constant 0 : index
    %29 = vector.load %arg14[%28, %c0_31, %c0_32] : memref<7x8x64xf32, #tpu.memory_space<vmem>>, vector<1x8x64xf32>
    %30 = vector.shape_cast %29 : vector<1x8x64xf32> to vector<8x64xf32>
    %31 = arith.addf %27, %30 : vector<8x64xf32>
    %32 = arith.negf %31 : vector<8x64xf32>
    %33 = math.exp %32 : vector<8x64xf32>
    %cst_33 = arith.constant 1.000000e+00 : f32
    %34 = vector.broadcast %cst_33 : f32 to vector<8x64xf32>
    %35 = arith.addf %34, %33 : vector<8x64xf32>
    %36 = arith.divf %34, %35 : vector<8x64xf32>
    %37 = vector.extract_strided_slice %36 {offsets = [0, 0], sizes = [8, 32], strides = [1, 1]} : vector<8x64xf32> to vector<8x32xf32>
    %38 = vector.extract_strided_slice %36 {offsets = [0, 32], sizes = [8, 32], strides = [1, 1]} : vector<8x64xf32> to vector<8x32xf32>
    %39 = arith.mulf %26, %38 : vector<8x32xf32>
    %cst_34 = arith.constant dense<0.000000e+00> : vector<8x32xf32>
    %40 = tpu.matmul %39, %17, %cst_34 {dimension_numbers = #tpu.dot_dimension_numbers<[1], [0], [0], [1], [0, 0, 1, 1], [], []>} : vector<8x32xf32>, vector<32x32xf32>, vector<8x32xf32> -> vector<8x32xf32>
    %41 = arith.index_cast %c0_i32 : i32 to index
    %c0_35 = arith.constant 0 : index
    %c0_36 = arith.constant 0 : index
    %42 = vector.load %arg15[%41, %c0_35, %c0_36] : memref<7x8x32xf32, #tpu.memory_space<vmem>>, vector<1x8x32xf32>
    %43 = vector.shape_cast %42 : vector<1x8x32xf32> to vector<8x32xf32>
    %44 = arith.addf %40, %43 : vector<8x32xf32>
    %cst_37 = arith.constant 1.000000e+00 : f32
    %45 = vector.broadcast %cst_37 : f32 to vector<8x32xf32>
    %46 = arith.subf %45, %37 : vector<8x32xf32>
    %47 = arith.mulf %46, %44 : vector<8x32xf32>
    %48 = arith.mulf %37, %26 : vector<8x32xf32>
    %49 = arith.addf %47, %48 : vector<8x32xf32>
    %50 = arith.index_cast %c0_i32 : i32 to index
    %51 = memref.load %arg0[%50] : memref<7xf32, #tpu.memory_space<smem>>
    %cst_38 = arith.constant dense<0.000000e+00> : vector<8x32xf32>
    %52 = tpu.matmul %49, %18, %cst_38 {dimension_numbers = #tpu.dot_dimension_numbers<[1], [0], [0], [1], [0, 0, 1, 1], [], []>} : vector<8x32xf32>, vector<32x32xf32>, vector<8x32xf32> -> vector<8x32xf32>
    %53 = arith.addf %52, %22 : vector<8x32xf32>
    %54 = math.tanh %53 : vector<8x32xf32>
    %55 = vector.broadcast %51 : f32 to vector<8x32xf32>
    %56 = arith.mulf %54, %55 : vector<8x32xf32>
    %57 = arith.addf %49, %56 : vector<8x32xf32>
    %cst_39 = arith.constant dense<0.000000e+00> : vector<8x6xf32>
    %58 = tpu.matmul %57, %19, %cst_39 {dimension_numbers = #tpu.dot_dimension_numbers<[1], [0], [0], [1], [0, 0, 1, 1], [], []>} : vector<8x32xf32>, vector<32x6xf32>, vector<8x6xf32> -> vector<8x6xf32>
    %59 = arith.addf %58, %25 : vector<8x6xf32>
    %cst_40 = arith.constant dense<0xFF800000> : vector<8xf32>
    %60 = vector.multi_reduction <maximumf>, %59, %cst_40 [1] : vector<8x6xf32> to vector<8xf32>
    %61 = vector.shape_cast %60 : vector<8xf32> to vector<8x1xf32>
    %62 = vector.broadcast %61 : vector<8x1xf32> to vector<8x6xf32>
    %63 = arith.subf %59, %62 : vector<8x6xf32>
    %64 = math.exp %63 : vector<8x6xf32>
    %cst_41 = arith.constant dense<0.000000e+00> : vector<8xf32>
    %65 = vector.multi_reduction <add>, %64, %cst_41 [1] : vector<8x6xf32> to vector<8xf32>
    %66 = vector.shape_cast %65 : vector<8xf32> to vector<8x1xf32>
    %67 = tpu.reciprocal %66 {approx = true} : vector<8x1xf32> -> vector<8x1xf32>
    %68 = vector.broadcast %67 : vector<8x1xf32> to vector<8x6xf32>
    %69 = arith.mulf %64, %68 : vector<8x6xf32>
    %70 = arith.index_cast %c0_i32 : i32 to index
    %c0_42 = arith.constant 0 : index
    %c0_43 = arith.constant 0 : index
    %71 = vector.load %arg12[%70, %c0_42, %c0_43] : memref<7x8x6xf32, #tpu.memory_space<vmem>>, vector<1x8x6xf32>
    %72 = vector.shape_cast %71 : vector<1x8x6xf32> to vector<8x6xf32>
    %73 = vector.shape_cast %69 : vector<8x6xf32> to vector<1x8x6xf32>
    tpu.vector_store %arg12[%70, %c0_42, %c0_43], %73 {strides = array<i32>} : memref<7x8x6xf32, #tpu.memory_space<vmem>>, vector<1x8x6xf32>,
    %74 = arith.index_cast %c0_i32 : i32 to index
    %c0_44 = arith.constant 0 : index
    %c0_45 = arith.constant 0 : index
    %75 = vector.load %arg13[%74, %c0_44, %c0_45] : memref<7x8x32xf32, #tpu.memory_space<vmem>>, vector<1x8x32xf32>
    %76 = vector.shape_cast %75 : vector<1x8x32xf32> to vector<8x32xf32>
    %77 = vector.shape_cast %57 : vector<8x32xf32> to vector<1x8x32xf32>
    tpu.vector_store %arg13[%74, %c0_44, %c0_45], %77 {strides = array<i32>} : memref<7x8x32xf32, #tpu.memory_space<vmem>>, vector<1x8x32xf32>,
    %c1_i32 = arith.constant 1 : i32
    %cst_46 = arith.constant dense<0.000000e+00> : vector<8x64xf32>
    %78 = tpu.matmul %57, %16, %cst_46 {dimension_numbers = #tpu.dot_dimension_numbers<[1], [0], [0], [1], [0, 0, 1, 1], [], []>} : vector<8x32xf32>, vector<32x64xf32>, vector<8x64xf32> -> vector<8x64xf32>
    %79 = arith.index_cast %c1_i32 : i32 to index
    %c0_47 = arith.constant 0 : index
    %c0_48 = arith.constant 0 : index
    %80 = vector.load %arg14[%79, %c0_47, %c0_48] : memref<7x8x64xf32, #tpu.memory_space<vmem>>, vector<1x8x64xf32>
    %81 = vector.shape_cast %80 : vector<1x8x64xf32> to vector<8x64xf32>
    %82 = arith.addf %78, %81 : vector<8x64xf32>
    %83 = arith.negf %82 : vector<8x64xf32>
    %84 = math.exp %83 : vector<8x64xf32>
    %cst_49 = arith.constant 1.000000e+00 : f32
    %85 = vector.broadcast %cst_49 : f32 to vector<8x64xf32>
    %86 = arith.addf %85, %84 : vector<8x64xf32>
    %87 = arith.divf %85, %86 : vector<8x64xf32>
    %88 = vector.extract_strided_slice %87 {offsets = [0, 0], sizes = [8, 32], strides = [1, 1]} : vector<8x64xf32> to vector<8x32xf32>
    %89 = vector.extract_strided_slice %87 {offsets = [0, 32], sizes = [8, 32], strides = [1, 1]} : vector<8x64xf32> to vector<8x32xf32>
    %90 = arith.mulf %57, %89 : vector<8x32xf32>
    %cst_50 = arith.constant dense<0.000000e+00> : vector<8x32xf32>
    %91 = tpu.matmul %90, %17, %cst_50 {dimension_numbers = #tpu.dot_dimension_numbers<[1], [0], [0], [1], [0, 0, 1, 1], [], []>} : vector<8x32xf32>, vector<32x32xf32>, vector<8x32xf32> -> vector<8x32xf32>
    %92 = arith.index_cast %c1_i32 : i32 to index
    %c0_51 = arith.constant 0 : index
    %c0_52 = arith.constant 0 : index
    %93 = vector.load %arg15[%92, %c0_51, %c0_52] : memref<7x8x32xf32, #tpu.memory_space<vmem>>, vector<1x8x32xf32>
    %94 = vector.shape_cast %93 : vector<1x8x32xf32> to vector<8x32xf32>
    %95 = arith.addf %91, %94 : vector<8x32xf32>
    %cst_53 = arith.constant 1.000000e+00 : f32
    %96 = vector.broadcast %cst_53 : f32 to vector<8x32xf32>
    %97 = arith.subf %96, %88 : vector<8x32xf32>
    %98 = arith.mulf %97, %95 : vector<8x32xf32>
    %99 = arith.mulf %88, %57 : vector<8x32xf32>
    %100 = arith.addf %98, %99 : vector<8x32xf32>
    %101 = arith.index_cast %c1_i32 : i32 to index
    %102 = memref.load %arg0[%101] : memref<7xf32, #tpu.memory_space<smem>>
    %cst_54 = arith.constant dense<0.000000e+00> : vector<8x32xf32>
    %103 = tpu.matmul %100, %18, %cst_54 {dimension_numbers = #tpu.dot_dimension_numbers<[1], [0], [0], [1], [0, 0, 1, 1], [], []>} : vector<8x32xf32>, vector<32x32xf32>, vector<8x32xf32> -> vector<8x32xf32>
    %104 = arith.addf %103, %22 : vector<8x32xf32>
    %105 = math.tanh %104 : vector<8x32xf32>
    %106 = vector.broadcast %102 : f32 to vector<8x32xf32>
    %107 = arith.mulf %105, %106 : vector<8x32xf32>
    %108 = arith.addf %100, %107 : vector<8x32xf32>
    %cst_55 = arith.constant dense<0.000000e+00> : vector<8x6xf32>
    %109 = tpu.matmul %108, %19, %cst_55 {dimension_numbers = #tpu.dot_dimension_numbers<[1], [0], [0], [1], [0, 0, 1, 1], [], []>} : vector<8x32xf32>, vector<32x6xf32>, vector<8x6xf32> -> vector<8x6xf32>
    %110 = arith.addf %109, %25 : vector<8x6xf32>
    %cst_56 = arith.constant dense<0xFF800000> : vector<8xf32>
    %111 = vector.multi_reduction <maximumf>, %110, %cst_56 [1] : vector<8x6xf32> to vector<8xf32>
    %112 = vector.shape_cast %111 : vector<8xf32> to vector<8x1xf32>
    %113 = vector.broadcast %112 : vector<8x1xf32> to vector<8x6xf32>
    %114 = arith.subf %110, %113 : vector<8x6xf32>
    %115 = math.exp %114 : vector<8x6xf32>
    %cst_57 = arith.constant dense<0.000000e+00> : vector<8xf32>
    %116 = vector.multi_reduction <add>, %115, %cst_57 [1] : vector<8x6xf32> to vector<8xf32>
    %117 = vector.shape_cast %116 : vector<8xf32> to vector<8x1xf32>
    %118 = tpu.reciprocal %117 {approx = true} : vector<8x1xf32> -> vector<8x1xf32>
    %119 = vector.broadcast %118 : vector<8x1xf32> to vector<8x6xf32>
    %120 = arith.mulf %115, %119 : vector<8x6xf32>
    %121 = arith.index_cast %c1_i32 : i32 to index
    %c0_58 = arith.constant 0 : index
    %c0_59 = arith.constant 0 : index
    %122 = vector.load %arg12[%121, %c0_58, %c0_59] : memref<7x8x6xf32, #tpu.memory_space<vmem>>, vector<1x8x6xf32>
    %123 = vector.shape_cast %122 : vector<1x8x6xf32> to vector<8x6xf32>
    %124 = vector.shape_cast %120 : vector<8x6xf32> to vector<1x8x6xf32>
    tpu.vector_store %arg12[%121, %c0_58, %c0_59], %124 {strides = array<i32>} : memref<7x8x6xf32, #tpu.memory_space<vmem>>, vector<1x8x6xf32>,
    %125 = arith.index_cast %c1_i32 : i32 to index
    %c0_60 = arith.constant 0 : index
    %c0_61 = arith.constant 0 : index
    %126 = vector.load %arg13[%125, %c0_60, %c0_61] : memref<7x8x32xf32, #tpu.memory_space<vmem>>, vector<1x8x32xf32>
    %127 = vector.shape_cast %126 : vector<1x8x32xf32> to vector<8x32xf32>
    %128 = vector.shape_cast %108 : vector<8x32xf32> to vector<1x8x32xf32>
    tpu.vector_store %arg13[%125, %c0_60, %c0_61], %128 {strides = array<i32>} : memref<7x8x32xf32, #tpu.memory_space<vmem>>, vector<1x8x32xf32>,
    %c2_i32 = arith.constant 2 : i32
    %cst_62 = arith.constant dense<0.000000e+00> : vector<8x64xf32>
    %129 = tpu.matmul %108, %16, %cst_62 {dimension_numbers = #tpu.dot_dimension_numbers<[1], [0], [0], [1], [0, 0, 1, 1], [], []>} : vector<8x32xf32>, vector<32x64xf32>, vector<8x64xf32> -> vector<8x64xf32>
    %130 = arith.index_cast %c2_i32 : i32 to index
    %c0_63 = arith.constant 0 : index
    %c0_64 = arith.constant 0 : index
    %131 = vector.load %arg14[%130, %c0_63, %c0_64] : memref<7x8x64xf32, #tpu.memory_space<vmem>>, vector<1x8x64xf32>
    %132 = vector.shape_cast %131 : vector<1x8x64xf32> to vector<8x64xf32>
    %133 = arith.addf %129, %132 : vector<8x64xf32>
    %134 = arith.negf %133 : vector<8x64xf32>
    %135 = math.exp %134 : vector<8x64xf32>
    %cst_65 = arith.constant 1.000000e+00 : f32
    %136 = vector.broadcast %cst_65 : f32 to vector<8x64xf32>
    %137 = arith.addf %136, %135 : vector<8x64xf32>
    %138 = arith.divf %136, %137 : vector<8x64xf32>
    %139 = vector.extract_strided_slice %138 {offsets = [0, 0], sizes = [8, 32], strides = [1, 1]} : vector<8x64xf32> to vector<8x32xf32>
    %140 = vector.extract_strided_slice %138 {offsets = [0, 32], sizes = [8, 32], strides = [1, 1]} : vector<8x64xf32> to vector<8x32xf32>
    %141 = arith.mulf %108, %140 : vector<8x32xf32>
    %cst_66 = arith.constant dense<0.000000e+00> : vector<8x32xf32>
    %142 = tpu.matmul %141, %17, %cst_66 {dimension_numbers = #tpu.dot_dimension_numbers<[1], [0], [0], [1], [0, 0, 1, 1], [], []>} : vector<8x32xf32>, vector<32x32xf32>, vector<8x32xf32> -> vector<8x32xf32>
    %143 = arith.index_cast %c2_i32 : i32 to index
    %c0_67 = arith.constant 0 : index
    %c0_68 = arith.constant 0 : index
    %144 = vector.load %arg15[%143, %c0_67, %c0_68] : memref<7x8x32xf32, #tpu.memory_space<vmem>>, vector<1x8x32xf32>
    %145 = vector.shape_cast %144 : vector<1x8x32xf32> to vector<8x32xf32>
    %146 = arith.addf %142, %145 : vector<8x32xf32>
    %cst_69 = arith.constant 1.000000e+00 : f32
    %147 = vector.broadcast %cst_69 : f32 to vector<8x32xf32>
    %148 = arith.subf %147, %139 : vector<8x32xf32>
    %149 = arith.mulf %148, %146 : vector<8x32xf32>
    %150 = arith.mulf %139, %108 : vector<8x32xf32>
    %151 = arith.addf %149, %150 : vector<8x32xf32>
    %152 = arith.index_cast %c2_i32 : i32 to index
    %153 = memref.load %arg0[%152] : memref<7xf32, #tpu.memory_space<smem>>
    %cst_70 = arith.constant dense<0.000000e+00> : vector<8x32xf32>
    %154 = tpu.matmul %151, %18, %cst_70 {dimension_numbers = #tpu.dot_dimension_numbers<[1], [0], [0], [1], [0, 0, 1, 1], [], []>} : vector<8x32xf32>, vector<32x32xf32>, vector<8x32xf32> -> vector<8x32xf32>
    %155 = arith.addf %154, %22 : vector<8x32xf32>
    %156 = math.tanh %155 : vector<8x32xf32>
    %157 = vector.broadcast %153 : f32 to vector<8x32xf32>
    %158 = arith.mulf %156, %157 : vector<8x32xf32>
    %159 = arith.addf %151, %158 : vector<8x32xf32>
    %cst_71 = arith.constant dense<0.000000e+00> : vector<8x6xf32>
    %160 = tpu.matmul %159, %19, %cst_71 {dimension_numbers = #tpu.dot_dimension_numbers<[1], [0], [0], [1], [0, 0, 1, 1], [], []>} : vector<8x32xf32>, vector<32x6xf32>, vector<8x6xf32> -> vector<8x6xf32>
    %161 = arith.addf %160, %25 : vector<8x6xf32>
    %cst_72 = arith.constant dense<0xFF800000> : vector<8xf32>
    %162 = vector.multi_reduction <maximumf>, %161, %cst_72 [1] : vector<8x6xf32> to vector<8xf32>
    %163 = vector.shape_cast %162 : vector<8xf32> to vector<8x1xf32>
    %164 = vector.broadcast %163 : vector<8x1xf32> to vector<8x6xf32>
    %165 = arith.subf %161, %164 : vector<8x6xf32>
    %166 = math.exp %165 : vector<8x6xf32>
    %cst_73 = arith.constant dense<0.000000e+00> : vector<8xf32>
    %167 = vector.multi_reduction <add>, %166, %cst_73 [1] : vector<8x6xf32> to vector<8xf32>
    %168 = vector.shape_cast %167 : vector<8xf32> to vector<8x1xf32>
    %169 = tpu.reciprocal %168 {approx = true} : vector<8x1xf32> -> vector<8x1xf32>
    %170 = vector.broadcast %169 : vector<8x1xf32> to vector<8x6xf32>
    %171 = arith.mulf %166, %170 : vector<8x6xf32>
    %172 = arith.index_cast %c2_i32 : i32 to index
    %c0_74 = arith.constant 0 : index
    %c0_75 = arith.constant 0 : index
    %173 = vector.load %arg12[%172, %c0_74, %c0_75] : memref<7x8x6xf32, #tpu.memory_space<vmem>>, vector<1x8x6xf32>
    %174 = vector.shape_cast %173 : vector<1x8x6xf32> to vector<8x6xf32>
    %175 = vector.shape_cast %171 : vector<8x6xf32> to vector<1x8x6xf32>
    tpu.vector_store %arg12[%172, %c0_74, %c0_75], %175 {strides = array<i32>} : memref<7x8x6xf32, #tpu.memory_space<vmem>>, vector<1x8x6xf32>,
    %176 = arith.index_cast %c2_i32 : i32 to index
    %c0_76 = arith.constant 0 : index
    %c0_77 = arith.constant 0 : index
    %177 = vector.load %arg13[%176, %c0_76, %c0_77] : memref<7x8x32xf32, #tpu.memory_space<vmem>>, vector<1x8x32xf32>
    %178 = vector.shape_cast %177 : vector<1x8x32xf32> to vector<8x32xf32>
    %179 = vector.shape_cast %159 : vector<8x32xf32> to vector<1x8x32xf32>
    tpu.vector_store %arg13[%176, %c0_76, %c0_77], %179 {strides = array<i32>} : memref<7x8x32xf32, #tpu.memory_space<vmem>>, vector<1x8x32xf32>,
    %c3_i32 = arith.constant 3 : i32
    %cst_78 = arith.constant dense<0.000000e+00> : vector<8x64xf32>
    %180 = tpu.matmul %159, %16, %cst_78 {dimension_numbers = #tpu.dot_dimension_numbers<[1], [0], [0], [1], [0, 0, 1, 1], [], []>} : vector<8x32xf32>, vector<32x64xf32>, vector<8x64xf32> -> vector<8x64xf32>
    %181 = arith.index_cast %c3_i32 : i32 to index
    %c0_79 = arith.constant 0 : index
    %c0_80 = arith.constant 0 : index
    %182 = vector.load %arg14[%181, %c0_79, %c0_80] : memref<7x8x64xf32, #tpu.memory_space<vmem>>, vector<1x8x64xf32>
    %183 = vector.shape_cast %182 : vector<1x8x64xf32> to vector<8x64xf32>
    %184 = arith.addf %180, %183 : vector<8x64xf32>
    %185 = arith.negf %184 : vector<8x64xf32>
    %186 = math.exp %185 : vector<8x64xf32>
    %cst_81 = arith.constant 1.000000e+00 : f32
    %187 = vector.broadcast %cst_81 : f32 to vector<8x64xf32>
    %188 = arith.addf %187, %186 : vector<8x64xf32>
    %189 = arith.divf %187, %188 : vector<8x64xf32>
    %190 = vector.extract_strided_slice %189 {offsets = [0, 0], sizes = [8, 32], strides = [1, 1]} : vector<8x64xf32> to vector<8x32xf32>
    %191 = vector.extract_strided_slice %189 {offsets = [0, 32], sizes = [8, 32], strides = [1, 1]} : vector<8x64xf32> to vector<8x32xf32>
    %192 = arith.mulf %159, %191 : vector<8x32xf32>
    %cst_82 = arith.constant dense<0.000000e+00> : vector<8x32xf32>
    %193 = tpu.matmul %192, %17, %cst_82 {dimension_numbers = #tpu.dot_dimension_numbers<[1], [0], [0], [1], [0, 0, 1, 1], [], []>} : vector<8x32xf32>, vector<32x32xf32>, vector<8x32xf32> -> vector<8x32xf32>
    %194 = arith.index_cast %c3_i32 : i32 to index
    %c0_83 = arith.constant 0 : index
    %c0_84 = arith.constant 0 : index
    %195 = vector.load %arg15[%194, %c0_83, %c0_84] : memref<7x8x32xf32, #tpu.memory_space<vmem>>, vector<1x8x32xf32>
    %196 = vector.shape_cast %195 : vector<1x8x32xf32> to vector<8x32xf32>
    %197 = arith.addf %193, %196 : vector<8x32xf32>
    %cst_85 = arith.constant 1.000000e+00 : f32
    %198 = vector.broadcast %cst_85 : f32 to vector<8x32xf32>
    %199 = arith.subf %198, %190 : vector<8x32xf32>
    %200 = arith.mulf %199, %197 : vector<8x32xf32>
    %201 = arith.mulf %190, %159 : vector<8x32xf32>
    %202 = arith.addf %200, %201 : vector<8x32xf32>
    %203 = arith.index_cast %c3_i32 : i32 to index
    %204 = memref.load %arg0[%203] : memref<7xf32, #tpu.memory_space<smem>>
    %cst_86 = arith.constant dense<0.000000e+00> : vector<8x32xf32>
    %205 = tpu.matmul %202, %18, %cst_86 {dimension_numbers = #tpu.dot_dimension_numbers<[1], [0], [0], [1], [0, 0, 1, 1], [], []>} : vector<8x32xf32>, vector<32x32xf32>, vector<8x32xf32> -> vector<8x32xf32>
    %206 = arith.addf %205, %22 : vector<8x32xf32>
    %207 = math.tanh %206 : vector<8x32xf32>
    %208 = vector.broadcast %204 : f32 to vector<8x32xf32>
    %209 = arith.mulf %207, %208 : vector<8x32xf32>
    %210 = arith.addf %202, %209 : vector<8x32xf32>
    %cst_87 = arith.constant dense<0.000000e+00> : vector<8x6xf32>
    %211 = tpu.matmul %210, %19, %cst_87 {dimension_numbers = #tpu.dot_dimension_numbers<[1], [0], [0], [1], [0, 0, 1, 1], [], []>} : vector<8x32xf32>, vector<32x6xf32>, vector<8x6xf32> -> vector<8x6xf32>
    %212 = arith.addf %211, %25 : vector<8x6xf32>
    %cst_88 = arith.constant dense<0xFF800000> : vector<8xf32>
    %213 = vector.multi_reduction <maximumf>, %212, %cst_88 [1] : vector<8x6xf32> to vector<8xf32>
    %214 = vector.shape_cast %213 : vector<8xf32> to vector<8x1xf32>
    %215 = vector.broadcast %214 : vector<8x1xf32> to vector<8x6xf32>
    %216 = arith.subf %212, %215 : vector<8x6xf32>
    %217 = math.exp %216 : vector<8x6xf32>
    %cst_89 = arith.constant dense<0.000000e+00> : vector<8xf32>
    %218 = vector.multi_reduction <add>, %217, %cst_89 [1] : vector<8x6xf32> to vector<8xf32>
    %219 = vector.shape_cast %218 : vector<8xf32> to vector<8x1xf32>
    %220 = tpu.reciprocal %219 {approx = true} : vector<8x1xf32> -> vector<8x1xf32>
    %221 = vector.broadcast %220 : vector<8x1xf32> to vector<8x6xf32>
    %222 = arith.mulf %217, %221 : vector<8x6xf32>
    %223 = arith.index_cast %c3_i32 : i32 to index
    %c0_90 = arith.constant 0 : index
    %c0_91 = arith.constant 0 : index
    %224 = vector.load %arg12[%223, %c0_90, %c0_91] : memref<7x8x6xf32, #tpu.memory_space<vmem>>, vector<1x8x6xf32>
    %225 = vector.shape_cast %224 : vector<1x8x6xf32> to vector<8x6xf32>
    %226 = vector.shape_cast %222 : vector<8x6xf32> to vector<1x8x6xf32>
    tpu.vector_store %arg12[%223, %c0_90, %c0_91], %226 {strides = array<i32>} : memref<7x8x6xf32, #tpu.memory_space<vmem>>, vector<1x8x6xf32>,
    %227 = arith.index_cast %c3_i32 : i32 to index
    %c0_92 = arith.constant 0 : index
    %c0_93 = arith.constant 0 : index
    %228 = vector.load %arg13[%227, %c0_92, %c0_93] : memref<7x8x32xf32, #tpu.memory_space<vmem>>, vector<1x8x32xf32>
    %229 = vector.shape_cast %228 : vector<1x8x32xf32> to vector<8x32xf32>
    %230 = vector.shape_cast %210 : vector<8x32xf32> to vector<1x8x32xf32>
    tpu.vector_store %arg13[%227, %c0_92, %c0_93], %230 {strides = array<i32>} : memref<7x8x32xf32, #tpu.memory_space<vmem>>, vector<1x8x32xf32>,
    %c4_i32 = arith.constant 4 : i32
    %cst_94 = arith.constant dense<0.000000e+00> : vector<8x64xf32>
    %231 = tpu.matmul %210, %16, %cst_94 {dimension_numbers = #tpu.dot_dimension_numbers<[1], [0], [0], [1], [0, 0, 1, 1], [], []>} : vector<8x32xf32>, vector<32x64xf32>, vector<8x64xf32> -> vector<8x64xf32>
    %232 = arith.index_cast %c4_i32 : i32 to index
    %c0_95 = arith.constant 0 : index
    %c0_96 = arith.constant 0 : index
    %233 = vector.load %arg14[%232, %c0_95, %c0_96] : memref<7x8x64xf32, #tpu.memory_space<vmem>>, vector<1x8x64xf32>
    %234 = vector.shape_cast %233 : vector<1x8x64xf32> to vector<8x64xf32>
    %235 = arith.addf %231, %234 : vector<8x64xf32>
    %236 = arith.negf %235 : vector<8x64xf32>
    %237 = math.exp %236 : vector<8x64xf32>
    %cst_97 = arith.constant 1.000000e+00 : f32
    %238 = vector.broadcast %cst_97 : f32 to vector<8x64xf32>
    %239 = arith.addf %238, %237 : vector<8x64xf32>
    %240 = arith.divf %238, %239 : vector<8x64xf32>
    %241 = vector.extract_strided_slice %240 {offsets = [0, 0], sizes = [8, 32], strides = [1, 1]} : vector<8x64xf32> to vector<8x32xf32>
    %242 = vector.extract_strided_slice %240 {offsets = [0, 32], sizes = [8, 32], strides = [1, 1]} : vector<8x64xf32> to vector<8x32xf32>
    %243 = arith.mulf %210, %242 : vector<8x32xf32>
    %cst_98 = arith.constant dense<0.000000e+00> : vector<8x32xf32>
    %244 = tpu.matmul %243, %17, %cst_98 {dimension_numbers = #tpu.dot_dimension_numbers<[1], [0], [0], [1], [0, 0, 1, 1], [], []>} : vector<8x32xf32>, vector<32x32xf32>, vector<8x32xf32> -> vector<8x32xf32>
    %245 = arith.index_cast %c4_i32 : i32 to index
    %c0_99 = arith.constant 0 : index
    %c0_100 = arith.constant 0 : index
    %246 = vector.load %arg15[%245, %c0_99, %c0_100] : memref<7x8x32xf32, #tpu.memory_space<vmem>>, vector<1x8x32xf32>
    %247 = vector.shape_cast %246 : vector<1x8x32xf32> to vector<8x32xf32>
    %248 = arith.addf %244, %247 : vector<8x32xf32>
    %cst_101 = arith.constant 1.000000e+00 : f32
    %249 = vector.broadcast %cst_101 : f32 to vector<8x32xf32>
    %250 = arith.subf %249, %241 : vector<8x32xf32>
    %251 = arith.mulf %250, %248 : vector<8x32xf32>
    %252 = arith.mulf %241, %210 : vector<8x32xf32>
    %253 = arith.addf %251, %252 : vector<8x32xf32>
    %254 = arith.index_cast %c4_i32 : i32 to index
    %255 = memref.load %arg0[%254] : memref<7xf32, #tpu.memory_space<smem>>
    %cst_102 = arith.constant dense<0.000000e+00> : vector<8x32xf32>
    %256 = tpu.matmul %253, %18, %cst_102 {dimension_numbers = #tpu.dot_dimension_numbers<[1], [0], [0], [1], [0, 0, 1, 1], [], []>} : vector<8x32xf32>, vector<32x32xf32>, vector<8x32xf32> -> vector<8x32xf32>
    %257 = arith.addf %256, %22 : vector<8x32xf32>
    %258 = math.tanh %257 : vector<8x32xf32>
    %259 = vector.broadcast %255 : f32 to vector<8x32xf32>
    %260 = arith.mulf %258, %259 : vector<8x32xf32>
    %261 = arith.addf %253, %260 : vector<8x32xf32>
    %cst_103 = arith.constant dense<0.000000e+00> : vector<8x6xf32>
    %262 = tpu.matmul %261, %19, %cst_103 {dimension_numbers = #tpu.dot_dimension_numbers<[1], [0], [0], [1], [0, 0, 1, 1], [], []>} : vector<8x32xf32>, vector<32x6xf32>, vector<8x6xf32> -> vector<8x6xf32>
    %263 = arith.addf %262, %25 : vector<8x6xf32>
    %cst_104 = arith.constant dense<0xFF800000> : vector<8xf32>
    %264 = vector.multi_reduction <maximumf>, %263, %cst_104 [1] : vector<8x6xf32> to vector<8xf32>
    %265 = vector.shape_cast %264 : vector<8xf32> to vector<8x1xf32>
    %266 = vector.broadcast %265 : vector<8x1xf32> to vector<8x6xf32>
    %267 = arith.subf %263, %266 : vector<8x6xf32>
    %268 = math.exp %267 : vector<8x6xf32>
    %cst_105 = arith.constant dense<0.000000e+00> : vector<8xf32>
    %269 = vector.multi_reduction <add>, %268, %cst_105 [1] : vector<8x6xf32> to vector<8xf32>
    %270 = vector.shape_cast %269 : vector<8xf32> to vector<8x1xf32>
    %271 = tpu.reciprocal %270 {approx = true} : vector<8x1xf32> -> vector<8x1xf32>
    %272 = vector.broadcast %271 : vector<8x1xf32> to vector<8x6xf32>
    %273 = arith.mulf %268, %272 : vector<8x6xf32>
    %274 = arith.index_cast %c4_i32 : i32 to index
    %c0_106 = arith.constant 0 : index
    %c0_107 = arith.constant 0 : index
    %275 = vector.load %arg12[%274, %c0_106, %c0_107] : memref<7x8x6xf32, #tpu.memory_space<vmem>>, vector<1x8x6xf32>
    %276 = vector.shape_cast %275 : vector<1x8x6xf32> to vector<8x6xf32>
    %277 = vector.shape_cast %273 : vector<8x6xf32> to vector<1x8x6xf32>
    tpu.vector_store %arg12[%274, %c0_106, %c0_107], %277 {strides = array<i32>} : memref<7x8x6xf32, #tpu.memory_space<vmem>>, vector<1x8x6xf32>,
    %278 = arith.index_cast %c4_i32 : i32 to index
    %c0_108 = arith.constant 0 : index
    %c0_109 = arith.constant 0 : index
    %279 = vector.load %arg13[%278, %c0_108, %c0_109] : memref<7x8x32xf32, #tpu.memory_space<vmem>>, vector<1x8x32xf32>
    %280 = vector.shape_cast %279 : vector<1x8x32xf32> to vector<8x32xf32>
    %281 = vector.shape_cast %261 : vector<8x32xf32> to vector<1x8x32xf32>
    tpu.vector_store %arg13[%278, %c0_108, %c0_109], %281 {strides = array<i32>} : memref<7x8x32xf32, #tpu.memory_space<vmem>>, vector<1x8x32xf32>,
    %c5_i32 = arith.constant 5 : i32
    %cst_110 = arith.constant dense<0.000000e+00> : vector<8x64xf32>
    %282 = tpu.matmul %261, %16, %cst_110 {dimension_numbers = #tpu.dot_dimension_numbers<[1], [0], [0], [1], [0, 0, 1, 1], [], []>} : vector<8x32xf32>, vector<32x64xf32>, vector<8x64xf32> -> vector<8x64xf32>
    %283 = arith.index_cast %c5_i32 : i32 to index
    %c0_111 = arith.constant 0 : index
    %c0_112 = arith.constant 0 : index
    %284 = vector.load %arg14[%283, %c0_111, %c0_112] : memref<7x8x64xf32, #tpu.memory_space<vmem>>, vector<1x8x64xf32>
    %285 = vector.shape_cast %284 : vector<1x8x64xf32> to vector<8x64xf32>
    %286 = arith.addf %282, %285 : vector<8x64xf32>
    %287 = arith.negf %286 : vector<8x64xf32>
    %288 = math.exp %287 : vector<8x64xf32>
    %cst_113 = arith.constant 1.000000e+00 : f32
    %289 = vector.broadcast %cst_113 : f32 to vector<8x64xf32>
    %290 = arith.addf %289, %288 : vector<8x64xf32>
    %291 = arith.divf %289, %290 : vector<8x64xf32>
    %292 = vector.extract_strided_slice %291 {offsets = [0, 0], sizes = [8, 32], strides = [1, 1]} : vector<8x64xf32> to vector<8x32xf32>
    %293 = vector.extract_strided_slice %291 {offsets = [0, 32], sizes = [8, 32], strides = [1, 1]} : vector<8x64xf32> to vector<8x32xf32>
    %294 = arith.mulf %261, %293 : vector<8x32xf32>
    %cst_114 = arith.constant dense<0.000000e+00> : vector<8x32xf32>
    %295 = tpu.matmul %294, %17, %cst_114 {dimension_numbers = #tpu.dot_dimension_numbers<[1], [0], [0], [1], [0, 0, 1, 1], [], []>} : vector<8x32xf32>, vector<32x32xf32>, vector<8x32xf32> -> vector<8x32xf32>
    %296 = arith.index_cast %c5_i32 : i32 to index
    %c0_115 = arith.constant 0 : index
    %c0_116 = arith.constant 0 : index
    %297 = vector.load %arg15[%296, %c0_115, %c0_116] : memref<7x8x32xf32, #tpu.memory_space<vmem>>, vector<1x8x32xf32>
    %298 = vector.shape_cast %297 : vector<1x8x32xf32> to vector<8x32xf32>
    %299 = arith.addf %295, %298 : vector<8x32xf32>
    %cst_117 = arith.constant 1.000000e+00 : f32
    %300 = vector.broadcast %cst_117 : f32 to vector<8x32xf32>
    %301 = arith.subf %300, %292 : vector<8x32xf32>
    %302 = arith.mulf %301, %299 : vector<8x32xf32>
    %303 = arith.mulf %292, %261 : vector<8x32xf32>
    %304 = arith.addf %302, %303 : vector<8x32xf32>
    %305 = arith.index_cast %c5_i32 : i32 to index
    %306 = memref.load %arg0[%305] : memref<7xf32, #tpu.memory_space<smem>>
    %cst_118 = arith.constant dense<0.000000e+00> : vector<8x32xf32>
    %307 = tpu.matmul %304, %18, %cst_118 {dimension_numbers = #tpu.dot_dimension_numbers<[1], [0], [0], [1], [0, 0, 1, 1], [], []>} : vector<8x32xf32>, vector<32x32xf32>, vector<8x32xf32> -> vector<8x32xf32>
    %308 = arith.addf %307, %22 : vector<8x32xf32>
    %309 = math.tanh %308 : vector<8x32xf32>
    %310 = vector.broadcast %306 : f32 to vector<8x32xf32>
    %311 = arith.mulf %309, %310 : vector<8x32xf32>
    %312 = arith.addf %304, %311 : vector<8x32xf32>
    %cst_119 = arith.constant dense<0.000000e+00> : vector<8x6xf32>
    %313 = tpu.matmul %312, %19, %cst_119 {dimension_numbers = #tpu.dot_dimension_numbers<[1], [0], [0], [1], [0, 0, 1, 1], [], []>} : vector<8x32xf32>, vector<32x6xf32>, vector<8x6xf32> -> vector<8x6xf32>
    %314 = arith.addf %313, %25 : vector<8x6xf32>
    %cst_120 = arith.constant dense<0xFF800000> : vector<8xf32>
    %315 = vector.multi_reduction <maximumf>, %314, %cst_120 [1] : vector<8x6xf32> to vector<8xf32>
    %316 = vector.shape_cast %315 : vector<8xf32> to vector<8x1xf32>
    %317 = vector.broadcast %316 : vector<8x1xf32> to vector<8x6xf32>
    %318 = arith.subf %314, %317 : vector<8x6xf32>
    %319 = math.exp %318 : vector<8x6xf32>
    %cst_121 = arith.constant dense<0.000000e+00> : vector<8xf32>
    %320 = vector.multi_reduction <add>, %319, %cst_121 [1] : vector<8x6xf32> to vector<8xf32>
    %321 = vector.shape_cast %320 : vector<8xf32> to vector<8x1xf32>
    %322 = tpu.reciprocal %321 {approx = true} : vector<8x1xf32> -> vector<8x1xf32>
    %323 = vector.broadcast %322 : vector<8x1xf32> to vector<8x6xf32>
    %324 = arith.mulf %319, %323 : vector<8x6xf32>
    %325 = arith.index_cast %c5_i32 : i32 to index
    %c0_122 = arith.constant 0 : index
    %c0_123 = arith.constant 0 : index
    %326 = vector.load %arg12[%325, %c0_122, %c0_123] : memref<7x8x6xf32, #tpu.memory_space<vmem>>, vector<1x8x6xf32>
    %327 = vector.shape_cast %326 : vector<1x8x6xf32> to vector<8x6xf32>
    %328 = vector.shape_cast %324 : vector<8x6xf32> to vector<1x8x6xf32>
    tpu.vector_store %arg12[%325, %c0_122, %c0_123], %328 {strides = array<i32>} : memref<7x8x6xf32, #tpu.memory_space<vmem>>, vector<1x8x6xf32>,
    %329 = arith.index_cast %c5_i32 : i32 to index
    %c0_124 = arith.constant 0 : index
    %c0_125 = arith.constant 0 : index
    %330 = vector.load %arg13[%329, %c0_124, %c0_125] : memref<7x8x32xf32, #tpu.memory_space<vmem>>, vector<1x8x32xf32>
    %331 = vector.shape_cast %330 : vector<1x8x32xf32> to vector<8x32xf32>
    %332 = vector.shape_cast %312 : vector<8x32xf32> to vector<1x8x32xf32>
    tpu.vector_store %arg13[%329, %c0_124, %c0_125], %332 {strides = array<i32>} : memref<7x8x32xf32, #tpu.memory_space<vmem>>, vector<1x8x32xf32>,
    %c6_i32 = arith.constant 6 : i32
    %cst_126 = arith.constant dense<0.000000e+00> : vector<8x64xf32>
    %333 = tpu.matmul %312, %16, %cst_126 {dimension_numbers = #tpu.dot_dimension_numbers<[1], [0], [0], [1], [0, 0, 1, 1], [], []>} : vector<8x32xf32>, vector<32x64xf32>, vector<8x64xf32> -> vector<8x64xf32>
    %334 = arith.index_cast %c6_i32 : i32 to index
    %c0_127 = arith.constant 0 : index
    %c0_128 = arith.constant 0 : index
    %335 = vector.load %arg14[%334, %c0_127, %c0_128] : memref<7x8x64xf32, #tpu.memory_space<vmem>>, vector<1x8x64xf32>
    %336 = vector.shape_cast %335 : vector<1x8x64xf32> to vector<8x64xf32>
    %337 = arith.addf %333, %336 : vector<8x64xf32>
    %338 = arith.negf %337 : vector<8x64xf32>
    %339 = math.exp %338 : vector<8x64xf32>
    %cst_129 = arith.constant 1.000000e+00 : f32
    %340 = vector.broadcast %cst_129 : f32 to vector<8x64xf32>
    %341 = arith.addf %340, %339 : vector<8x64xf32>
    %342 = arith.divf %340, %341 : vector<8x64xf32>
    %343 = vector.extract_strided_slice %342 {offsets = [0, 0], sizes = [8, 32], strides = [1, 1]} : vector<8x64xf32> to vector<8x32xf32>
    %344 = vector.extract_strided_slice %342 {offsets = [0, 32], sizes = [8, 32], strides = [1, 1]} : vector<8x64xf32> to vector<8x32xf32>
    %345 = arith.mulf %312, %344 : vector<8x32xf32>
    %cst_130 = arith.constant dense<0.000000e+00> : vector<8x32xf32>
    %346 = tpu.matmul %345, %17, %cst_130 {dimension_numbers = #tpu.dot_dimension_numbers<[1], [0], [0], [1], [0, 0, 1, 1], [], []>} : vector<8x32xf32>, vector<32x32xf32>, vector<8x32xf32> -> vector<8x32xf32>
    %347 = arith.index_cast %c6_i32 : i32 to index
    %c0_131 = arith.constant 0 : index
    %c0_132 = arith.constant 0 : index
    %348 = vector.load %arg15[%347, %c0_131, %c0_132] : memref<7x8x32xf32, #tpu.memory_space<vmem>>, vector<1x8x32xf32>
    %349 = vector.shape_cast %348 : vector<1x8x32xf32> to vector<8x32xf32>
    %350 = arith.addf %346, %349 : vector<8x32xf32>
    %cst_133 = arith.constant 1.000000e+00 : f32
    %351 = vector.broadcast %cst_133 : f32 to vector<8x32xf32>
    %352 = arith.subf %351, %343 : vector<8x32xf32>
    %353 = arith.mulf %352, %350 : vector<8x32xf32>
    %354 = arith.mulf %343, %312 : vector<8x32xf32>
    %355 = arith.addf %353, %354 : vector<8x32xf32>
    %356 = arith.index_cast %c6_i32 : i32 to index
    %357 = memref.load %arg0[%356] : memref<7xf32, #tpu.memory_space<smem>>
    %cst_134 = arith.constant dense<0.000000e+00> : vector<8x32xf32>
    %358 = tpu.matmul %355, %18, %cst_134 {dimension_numbers = #tpu.dot_dimension_numbers<[1], [0], [0], [1], [0, 0, 1, 1], [], []>} : vector<8x32xf32>, vector<32x32xf32>, vector<8x32xf32> -> vector<8x32xf32>
    %359 = arith.addf %358, %22 : vector<8x32xf32>
    %360 = math.tanh %359 : vector<8x32xf32>
    %361 = vector.broadcast %357 : f32 to vector<8x32xf32>
    %362 = arith.mulf %360, %361 : vector<8x32xf32>
    %363 = arith.addf %355, %362 : vector<8x32xf32>
    %cst_135 = arith.constant dense<0.000000e+00> : vector<8x6xf32>
    %364 = tpu.matmul %363, %19, %cst_135 {dimension_numbers = #tpu.dot_dimension_numbers<[1], [0], [0], [1], [0, 0, 1, 1], [], []>} : vector<8x32xf32>, vector<32x6xf32>, vector<8x6xf32> -> vector<8x6xf32>
    %365 = arith.addf %364, %25 : vector<8x6xf32>
    %cst_136 = arith.constant dense<0xFF800000> : vector<8xf32>
    %366 = vector.multi_reduction <maximumf>, %365, %cst_136 [1] : vector<8x6xf32> to vector<8xf32>
    %367 = vector.shape_cast %366 : vector<8xf32> to vector<8x1xf32>
    %368 = vector.broadcast %367 : vector<8x1xf32> to vector<8x6xf32>
    %369 = arith.subf %365, %368 : vector<8x6xf32>
    %370 = math.exp %369 : vector<8x6xf32>
    %cst_137 = arith.constant dense<0.000000e+00> : vector<8xf32>
    %371 = vector.multi_reduction <add>, %370, %cst_137 [1] : vector<8x6xf32> to vector<8xf32>
    %372 = vector.shape_cast %371 : vector<8xf32> to vector<8x1xf32>
    %373 = tpu.reciprocal %372 {approx = true} : vector<8x1xf32> -> vector<8x1xf32>
    %374 = vector.broadcast %373 : vector<8x1xf32> to vector<8x6xf32>
    %375 = arith.mulf %370, %374 : vector<8x6xf32>
    %376 = arith.index_cast %c6_i32 : i32 to index
    %c0_138 = arith.constant 0 : index
    %c0_139 = arith.constant 0 : index
    %377 = vector.load %arg12[%376, %c0_138, %c0_139] : memref<7x8x6xf32, #tpu.memory_space<vmem>>, vector<1x8x6xf32>
    %378 = vector.shape_cast %377 : vector<1x8x6xf32> to vector<8x6xf32>
    %379 = vector.shape_cast %375 : vector<8x6xf32> to vector<1x8x6xf32>
    tpu.vector_store %arg12[%376, %c0_138, %c0_139], %379 {strides = array<i32>} : memref<7x8x6xf32, #tpu.memory_space<vmem>>, vector<1x8x6xf32>,
    %380 = arith.index_cast %c6_i32 : i32 to index
    %c0_140 = arith.constant 0 : index
    %c0_141 = arith.constant 0 : index
    %381 = vector.load %arg13[%380, %c0_140, %c0_141] : memref<7x8x32xf32, #tpu.memory_space<vmem>>, vector<1x8x32xf32>
    %382 = vector.shape_cast %381 : vector<1x8x32xf32> to vector<8x32xf32>
    %383 = vector.shape_cast %363 : vector<8x32xf32> to vector<1x8x32xf32>
    tpu.vector_store %arg13[%380, %c0_140, %c0_141], %383 {strides = array<i32>} : memref<7x8x32xf32, #tpu.memory_space<vmem>>, vector<1x8x32xf32>,
    %c7_i32 = arith.constant 7 : i32
    return
  }
}

</mosaic_0001>

<bundles_post_ra>
// kernel: tpu_custom_call.1
= control target key start
LH: loop header
LB: loop body
LE: loop exit
PB: predicated region body
PF: predicated region fallthrough
CT: control target
= control target key end

     0   :  { %19 = vsyncpa [#allocation7], 0  ;;  %s4347_s0 = inlined_call_operand.vmem [shape: f32[7], index: 0, kind: input, shape index: {}]   ;;  %s4348_s1 = inlined_call_operand.hbm [shape: f32[7,8,8], index: 1, kind: input, shape index: {}]   ;;  %s4349_s2 = inlined_call_operand.vmem [shape: f32[32,64], index: 2, kind: input, shape index: {}]   ;;  %s4350_s3 = inlined_call_operand.hbm [shape: f32[8,64], index: 3, kind: input, shape index: {}]   ;;  %s4351_s4 = inlined_call_operand.vmem [shape: f32[1,64], index: 4, kind: input, shape index: {}]   ;;  %s4352_s5 = inlined_call_operand.hbm [shape: f32[32,32], index: 5, kind: input, shape index: {}]   ;;  %s4353_s6 = inlined_call_operand.hbm [shape: f32[8,32], index: 6, kind: input, shape index: {}]   ;;  %s4354_s7 = inlined_call_operand.hbm [shape: f32[1,32], index: 7, kind: input, shape index: {}]   ;;  %s4355_s8 = inlined_call_operand.vmem [shape: f32[32,32], index: 8, kind: input, shape index: {}]   ;;  %s4356_s9 = inlined_call_operand.hbm [shape: f32[1,32], index: 9, kind: input, shape index: {}]   ;;  %s4357_s10 = inlined_call_operand.vmem [shape: f32[32,6], index: 10, kind: input, shape index: {}]   ;;  %s4358_s11 = inlined_call_operand.vmem [shape: f32[1,6], index: 11, kind: input, shape index: {}]   ;;  %s4359_s12 = inlined_call_operand.vmem [shape: f32[7,8,6], index: 12, kind: output, shape index: {0}]   ;;  %s4360_s13 = inlined_call_operand.hbm [shape: f32[7,8,32], index: 13, kind: output, shape index: {1}]  }
   0x1   :  { %20 = vsyncpa [#allocation5], 0 }
   0x2   :  { %21 = vsyncpa [#allocation10], 0 }
   0x3   :  { %22 = vsyncpa [#allocation13], 0 }
   0x4   :  { %23 = vsyncpa [#allocation16], 0 }
   0x5   :  { %24 = vsyncpa [#allocation6], 0  ;;  %s3744_s25 = smov [#allocation9]   ;;  %s3745_s27 = smov [#allocation12]  }
   0x6   :  { %s55_s26 = sshll.u32 %s3744_s25, 4  ;;  %s79_s28 = sshll.u32 %s3745_s27, 4  ;;  %s56_s26 = int_to_ptr.vmem [resolvable:$true] %s55_s26  ;;  %s80_s28 = int_to_ptr.vmem [resolvable:$true] %s79_s28 }
   0x7   :  { %s3566_s14 = scalar_lea.hbm %s4350_s3, 128 }
   0x8   :  { %p3567_p0 = scmp.ne.s32.totalorder %s4350_s3, %s3566_s14  ;;  %p3570_p1 = scmp.lt.u32.totalorder %s3566_s14, %s4350_s3 }
   0xa   :  { %p3572_p2 = pnand %p3570_p1, %p3567_p0 }
   0xc   :  { %3575 = shalt.err (!%p3572_p2)
}
   0xd   :  { %s3576_s19 = scalar_lea.vmem %s56_s26, 128  ;;  %p3581_p4 = scmp.lt.s32.totalorder %s56_s26, %s56_s26 }
   0xe   :  { %p3577_p3 = scmp.ne.s32.totalorder %s56_s26, %s3576_s19  ;;  %p3582_p5 = scmp.lt.s32.totalorder %s3576_s19, %s3576_s19 }
  0x10   :  { %p3583_p6 = por %p3582_p5, %p3581_p4 }
  0x12   :  { %p3584_p7 = pnand %p3583_p6, %p3577_p3 }
  0x14   :  { %3587 = shalt.err (!%p3584_p7)
}
  0x15   :  { %58 = dma.hbm_to_vmem [thread:$0]  %s4350_s3, 128, %s56_s26, [#allocation10]  }
  0x16   :  { %s3588_s24 = scalar_lea.hbm %s4353_s6, 128 }
  0x17   :  { %p3589_p8 = scmp.ne.s32.totalorder %s4353_s6, %s3588_s24  ;;  %p3592_p9 = scmp.lt.u32.totalorder %s3588_s24, %s4353_s6 }
  0x19   :  { %p3594_p10 = pnand %p3592_p9, %p3589_p8 }
  0x1b   :  { %3597 = shalt.err (!%p3594_p10)
}
  0x1c   :  { %s3598_s14 = scalar_lea.vmem %s80_s28, 128  ;;  %p3603_p12 = scmp.lt.s32.totalorder %s80_s28, %s80_s28 }
  0x1d   :  { %p3599_p11 = scmp.ne.s32.totalorder %s80_s28, %s3598_s14  ;;  %p3604_p13 = scmp.lt.s32.totalorder %s3598_s14, %s3598_s14 }
  0x1f   :  { %p3605_p0 = por %p3604_p13, %p3603_p12 }
  0x21   :  { %p3606_p1 = pnand %p3605_p0, %p3599_p11 }
  0x23   :  { %3609 = shalt.err (!%p3606_p1)
}
  0x24   :  { %82 = dma.hbm_to_vmem [thread:$0]  %s4353_s6, 128, %s80_s28, [#allocation13]  }
  0x25   :  { %s31_s17 = sshll.u32 %s4347_s0, 4  ;;  %s32_s17 = int_to_ptr.vmem [resolvable:$true] %s31_s17 }
  0x26   :  { %s3610_s18 = scalar_lea.vmem %s32_s17, 16  ;;  %p3615_p3 = scmp.lt.s32.totalorder %s32_s17, %s32_s17 }
  0x27   :  { %p3611_p2 = scmp.ne.s32.totalorder %s32_s17, %s3610_s18  ;;  %p3616_p4 = scmp.lt.s32.totalorder %s3610_s18, %s3610_s18 }
  0x29   :  { %p3617_p5 = por %p3616_p4, %p3615_p3 }
  0x2b   :  { %p3618_p6 = pnand %p3617_p5, %p3611_p2 }
  0x2d   :  { %3621 = shalt.err (!%p3618_p6)
}
  0x2e   :  { %s3746_s19 = smov [#allocation4]   ;;  %s3747_s20 = smov [#allocation8]  }
  0x2f   :  { %34 = dma.vmem_to_smem %s32_s17, 16, %s3746_s19, [#allocation7]  }
  0x30   :  { %s40_s21 = sshll.u32 %s3747_s20, 4  ;;  %s3622_s6 = scalar_lea.hbm %s4348_s1, 896  ;;  %s41_s21 = int_to_ptr.vmem [resolvable:$true] %s40_s21 }
  0x31   :  { %p3623_p7 = scmp.ne.s32.totalorder %s4348_s1, %s3622_s6  ;;  %p3626_p8 = scmp.lt.u32.totalorder %s3622_s6, %s4348_s1 }
  0x33   :  { %p3628_p9 = pnand %p3626_p8, %p3623_p7 }
  0x35   :  { %3631 = shalt.err (!%p3628_p9)
}
  0x36   :  { %s3632_s27 = scalar_lea.vmem %s41_s21, 896  ;;  %p3637_p11 = scmp.lt.s32.totalorder %s41_s21, %s41_s21 }
  0x37   :  { %p3633_p10 = scmp.ne.s32.totalorder %s41_s21, %s3632_s27  ;;  %p3638_p12 = scmp.lt.s32.totalorder %s3632_s27, %s3632_s27 }
  0x39   :  { %p3639_p13 = por %p3638_p12, %p3637_p11 }
  0x3b   :  { %p3640_p0 = pnand %p3639_p13, %p3633_p10 }
  0x3d   :  { %3643 = shalt.err (!%p3640_p0)
}
  0x3e   :  { %s3748_s29 = smov 128   ;;  %s3749_s30 = smov 8  }
  0x3f   :  { %46 = dma.hbm_to_vmem [thread:$0]  %s4348_s1, 896, %s41_s21, [#allocation5], %s3748_s29, %s3748_s29, %s3749_s30  }
  0x40   :  { %s3750_s26 = smov [#allocation11]   ;;  %s3751_s16 = smov [#allocation14]  }
  0x41   :  { %s66_s15 = sshll.u32 %s3750_s26, 4  ;;  %s89_s17 = sshll.u32 %s3751_s16, 4  ;;  %s67_s15 = int_to_ptr.vmem [resolvable:$true] %s66_s15  ;;  %s90_s17 = int_to_ptr.vmem [resolvable:$true] %s89_s17 }
  0x42   :  { %s3644_s20 = scalar_lea.hbm %s4352_s5, 512 }
  0x43   :  { %p3645_p1 = scmp.ne.s32.totalorder %s4352_s5, %s3644_s20  ;;  %p3648_p2 = scmp.lt.u32.totalorder %s3644_s20, %s4352_s5 }
  0x45   :  { %p3650_p3 = pnand %p3648_p2, %p3645_p1 }
  0x47   :  { %3653 = shalt.err (!%p3650_p3)
}
  0x48   :  { %s3654_s1 = scalar_lea.vmem %s67_s15, 512  ;;  %p3659_p5 = scmp.lt.s32.totalorder %s67_s15, %s67_s15 }
  0x49   :  { %p3655_p4 = scmp.ne.s32.totalorder %s67_s15, %s3654_s1  ;;  %p3660_p6 = scmp.lt.s32.totalorder %s3654_s1, %s3654_s1 }
  0x4b   :  { %p3661_p7 = por %p3660_p6, %p3659_p5 }
  0x4d   :  { %p3662_p8 = pnand %p3661_p7, %p3655_p4 }
  0x4f   :  { %3665 = shalt.err (!%p3662_p8)
}
  0x50   :  { %72 = dma.hbm_to_vmem [thread:$0]  %s4352_s5, 512, %s67_s15, [#allocation10], %s3748_s29, %s3748_s29, %s3749_s30  }
  0x51   :  { %s3666_s27 = scalar_lea.hbm %s4354_s7, 16 }
  0x52   :  { %p3667_p9 = scmp.ne.s32.totalorder %s4354_s7, %s3666_s27  ;;  %p3670_p10 = scmp.lt.u32.totalorder %s3666_s27, %s4354_s7 }
  0x54   :  { %p3672_p11 = pnand %p3670_p10, %p3667_p9 }
  0x56   :  { %3675 = shalt.err (!%p3672_p11)
}
  0x57   :  { %s3676_s18 = scalar_lea.vmem %s90_s17, 16  ;;  %s3680_s19 = scalar_lea.vmem %s90_s17, 32 }
  0x58   :  { %p3677_p12 = scmp.ne.s32.totalorder %s90_s17, %s3676_s18  ;;  %p3681_p13 = scmp.lt.s32.totalorder %s90_s17, %s90_s17 }
  0x59   :  { %p3682_p0 = scmp.lt.s32.totalorder %s3680_s19, %s3676_s18 }
  0x5b   :  { %p3683_p1 = por %p3682_p0, %p3681_p13 }
  0x5d   :  { %p3684_p2 = pnand %p3683_p1, %p3677_p12 }
  0x5f   :  { %3687 = shalt.err (!%p3684_p2)
}
  0x60   :  { %92 = dma.hbm_to_vmem [thread:$0]  %s4354_s7, 16, %s90_s17, [#allocation13]  }
  0x61   :  { %s3752_s20 = smov [#allocation15]   ;;  %s3688_s28 = scalar_lea.hbm %s4356_s9, 16 }
  0x62   :  { %s101_s22 = sshll.u32 %s3752_s20, 4  ;;  %p3689_p3 = scmp.ne.s32.totalorder %s4356_s9, %s3688_s28  ;;  %s102_s22 = int_to_ptr.vmem [resolvable:$true] %s101_s22 }
  0x63   :  { %p3692_p4 = scmp.lt.u32.totalorder %s3688_s28, %s4356_s9 }
  0x65   :  { %p3694_p5 = pnand %p3692_p4, %p3689_p3 }
  0x67   :  { %3697 = shalt.err (!%p3694_p5)
}
  0x68   :  { %s3698_s25 = scalar_lea.vmem %s102_s22, 16  ;;  %s3702_s7 = scalar_lea.vmem %s102_s22, 32 }
  0x69   :  { %p3699_p6 = scmp.ne.s32.totalorder %s102_s22, %s3698_s25  ;;  %p3703_p7 = scmp.lt.s32.totalorder %s102_s22, %s102_s22 }
  0x6a   :  { %p3704_p8 = scmp.lt.s32.totalorder %s3702_s7, %s3698_s25 }
  0x6c   :  { %p3705_p9 = por %p3704_p8, %p3703_p7 }
  0x6e   :  { %p3706_p10 = pnand %p3705_p9, %p3699_p6 }
  0x70   :  { %3709 = shalt.err (!%p3706_p10)
}
  0x71   :  { %104 = dma.hbm_to_vmem [thread:$0]  %s4356_s9, 16, %s102_s22, [#allocation16]  }
  0x72   :  { %3732 = dma.done.wait [#allocation7], 16  }
  0x73   :  { %3733 = vsyncadd [#allocation7], 4294967280 }
  0x74   :  { %3734 = dma.done.wait [#allocation5], 896  }
  0x75   :  { %3735 = vsyncadd [#allocation5], 4294966400 }
  0x76   :  { %3736 = dma.done.wait [#allocation10], 640  }
  0x77   :  { %3737 = vsyncadd [#allocation10], 4294966656 }
  0x78   :  { %3738 = dma.done.wait [#allocation13], 144  }
  0x79   :  { %3739 = vsyncadd [#allocation13], 4294967152 }
  0x7a   :  { %3740 = dma.done.wait [#allocation16], 16  }
  0x7b   :  { %3741 = vsyncadd [#allocation16], 4294967280 }
  0x7c   :  { %130 = sfence }
  0x7d   :  { %v138_v0 = vld [vmem:[#allocation9] sm:$0xff]  ;;  %v131_v1 = vld [vmem:[#allocation8] sm:$0xff]  ;;  %vm146_vm0 = vcmask 64512   ;;  %v3753_v2 = vmov 0.0   ;;  %vm3754_vm1 = vmmov 0   ;;  %v392_v3 = vld [vmem:[%s4349_s2] sm:$0xff] }
  0x7e   :  { %2960 = vmatprep.subr.mxu0 %v3753_v2  ;;  %2962 = vmatprep.mubr.msk.f32.mxu0 %vm3754_vm1, %v3753_v2  ;;  %v393_v4 = vld [vmem:[%s4349_s2 + $0x8] sm:$0xff]  ;;  %v394_v6 = vld [vmem:[%s4349_s2 + $0x10] sm:$0xff]  ;;  %v3755_v7 = vmov 0.0|0.0   ;;  %v395_v8 = vld [vmem:[%s4349_s2 + $0x18] sm:$0xff]  ;;  %vm268_vm2 = vcmask 523264   ;;  %vm384_vm3 = vcmask 261120  }
  0x7f   :  { %2961 = vmatpush3.msra.mxu0 %v138_v0  ;;  %v3918_v5 = vpack.c.bf16 %v393_v4, %v392_v3  ;;  %2983 = vmatprep.subr.mxu1 %v3753_v2  ;;  %v132_v9 = vld [vmem:[#allocation8 + $0x8] sm:$0xff]  ;;  %v3932_v10 = vpack.c.bf16 %v395_v8, %v394_v6  ;;  %v133_v11 = vld [vmem:[#allocation8 + $0x10] sm:$0xff]  ;;  %v134_v12 = vld [vmem:[#allocation8 + $0x18] sm:$0xff]  ;;  %s582_s3 = sld [smem:[#allocation4]]  ;;  %s2772_s26 = sld [smem:[#allocation4 + $0x2]]  ;;  %vm733_vm4 = vcmask 48128  }
  0x80   :  { %2963 = vmatmul.mubr.msk.f32.vlgmr.msra.gmra.mrb[0].mxu0 %vm146_vm0, %v131_v1  ;;  %3314 = vmatprep.subr.bf16.mxu0 %v3755_v7  ;;  %v135_v13 = vld [vmem:[#allocation8 + $0x20] sm:$0xff]  ;;  %v136_v14 = vld [vmem:[#allocation8 + $0x28] sm:$0xff]  ;;  %v137_v15 = vld [vmem:[#allocation8 + $0x30] sm:$0xff]  ;;  %s2779_s16 = sld [smem:[#allocation4 + $0x3]]  ;;  %s2786_s18 = sld [smem:[#allocation4 + $0x4]] }
  0x81   :  { %3316 = vmatpush3.bf16.msra.mxu0 %v3918_v5  ;;  %2965 = vmatprep.mubr.msk.f32.mxu0 %vm3754_vm1, %v3753_v2  ;;  %v276_v16 = vld [vmem:[#allocation12] sm:$0xff]  ;;  %v397_v18 = vld [vmem:[#allocation11 + $0x8] sm:$0xff]  ;;  %v398_v20 = vld [vmem:[#allocation11 + $0x10] sm:$0xff]  ;;  %s2800_s6 = sld [smem:[#allocation4 + $0x6]]  ;;  %s3757_s25 = smov [#allocation17]  }
  0x82   :  { %3317 = vmatprep.subr.bf16.mxu0 %v3755_v7  ;;  %2985 = vmatprep.mubr.msk.f32.mxu1 %vm3754_vm1, %v3753_v2  ;;  %v396_v17 = vld [vmem:[#allocation11] sm:$0xff]  ;;  %v399_v21 = vld [vmem:[#allocation11 + $0x18] sm:$0xff]  ;;  %v2740_v23 = vld [vmem:[%s4351_s4] ss:$0 sm:$0xff]  ;;  %s3756_s4 = smov 96   ;;  %s2722_s7 = sshll.u32 %s3757_s25, 4  ;;  %s2723_s7 = int_to_ptr.vmem [resolvable:$true] %s2722_s7 }
  0x83   :  { %2984 = vmatpush3.msra.mxu1 %v276_v16  ;;  %v3960_v19 = vpack.c.bf16 %v397_v18, %v396_v17  ;;  %v3967_v22 = vpack.c.bf16 %v399_v21, %v398_v20  ;;  %v2748_v54 = vld [vmem:[#allocation14] ss:$0 sm:$0xff]  ;;  %v400_v17 = vld [vmem:[%s4355_s8] sm:$0xff]  ;;  %v401_v18 = vld [vmem:[%s4355_s8 + $0x8] sm:$0xff]  ;;  %s3710_s17 = scalar_lea.vmem %s2723_s7, 896  ;;  %p3715_p12 = scmp.lt.s32.totalorder %s2723_s7, %s2723_s7 }
  0x84   :  { %2966 = vmatmul.mubr.msk.f32.gmra.mrb[2].mxu0 %vm146_vm0, %v132_v9  ;;  %2986 = vmatmul.mubr.msk.f32.vlgmr.msra.gmra.mrb[0].mxu1 %vm146_vm0, %v131_v1  ;;  %v4017_v20 = vpack.c.bf16 %v401_v18, %v400_v17  ;;  %v402_v21 = vld [vmem:[%s4355_s8 + $0x10] sm:$0xff]  ;;  %p3711_p11 = scmp.ne.s32.totalorder %s2723_s7, %s3710_s17  ;;  %p3716_p13 = scmp.lt.s32.totalorder %s3710_s17, %s3710_s17 }
  0x85   :  { %2968 = vmatprep.mubr.msk.f32.mxu0 %vm3754_vm1, %v3753_v2  ;;  %3319 = vmatpush3.bf16.msra.mxu0 %v3932_v10 }
  0x86   :  { %3326 = vmatprep.subr.bf16.mxu0 %v3755_v7  ;;  %3320 = vmatprep.subr.bf16.mxu1 %v3755_v7  ;;  %p3717_p0 = por %p3716_p13, %p3715_p12 }
  0x87   :  { %3322 = vmatpush3.bf16.msra.mxu1 %v3960_v19  ;;  %2988 = vmatprep.mubr.msk.f32.mxu1 %vm3754_vm1, %v3753_v2 }
  0x88   :  { %2969 = vmatmul.mubr.msk.f32.gmra.mrb[4].mxu0 %vm146_vm0, %v133_v11  ;;  %3323 = vmatprep.subr.bf16.mxu1 %v3755_v7  ;;  %p3718_p1 = pnand %p3717_p0, %p3711_p11 }
  0x89   :  { %2971 = vmatprep.mubr.msk.f32.mxu0 %vm3754_vm1, %v3753_v2  ;;  %2989 = vmatmul.mubr.msk.f32.gmra.mrb[2].mxu1 %vm146_vm0, %v132_v9 }
  0x8a   :  { %2991 = vmatprep.mubr.msk.f32.mxu1 %vm3754_vm1, %v3753_v2 }
  0x8b   :  { %3325 = vmatpush3.bf16.msra.mxu1 %v3967_v22 }
  0x8c   :  { %2972 = vmatmul.mubr.msk.f32.gmra.mrb[6].mxu0 %vm146_vm0, %v134_v12  ;;  %3332 = vmatprep.subr.bf16.mxu1 %v3755_v7 }
  0x8d   :  { %2974 = vmatprep.mubr.msk.f32.mxu0 %vm3754_vm1, %v3753_v2  ;;  %2992 = vmatmul.mubr.msk.f32.gmra.mrb[4].mxu1 %vm146_vm0, %v133_v11 }
  0x8e   :  { %2994 = vmatprep.mubr.msk.f32.mxu1 %vm3754_vm1, %v3753_v2 }
  0x90   :  { %2975 = vmatmul.mubr.msk.f32.gmra.mrb[8].mxu0 %vm146_vm0, %v135_v13 }
  0x91   :  { %2977 = vmatprep.mubr.msk.f32.mxu0 %vm3754_vm1, %v3753_v2  ;;  %2995 = vmatmul.mubr.msk.f32.gmra.mrb[6].mxu1 %vm146_vm0, %v134_v12 }
  0x92   :  { %2997 = vmatprep.mubr.msk.f32.mxu1 %vm3754_vm1, %v3753_v2 }
  0x94   :  { %2978 = vmatmul.mubr.msk.f32.gmra.mrb[10].mxu0 %vm146_vm0, %v136_v14 }
  0x95   :  { %2980 = vmatprep.mubr.msk.f32.mxu0 %vm3754_vm1, %v3753_v2  ;;  %2998 = vmatmul.mubr.msk.f32.gmra.mrb[8].mxu1 %vm146_vm0, %v135_v13 }
  0x96   :  { %3000 = vmatprep.mubr.msk.f32.mxu1 %vm3754_vm1, %v3753_v2 }
  0x98   :  { %2981 = vmatmul.mubr.msk.f32.gmra.mrb[12].mxu0 %vm146_vm0, %v137_v15 }
  0x99   :  { %3014 = vmatprep.mubr.msk.f32.mxu0 %vm3754_vm1, %v3753_v2  ;;  %3001 = vmatmul.mubr.msk.f32.gmra.mrb[10].mxu1 %vm146_vm0, %v136_v14 }
  0x9a   :  { %3003 = vmatprep.mubr.msk.f32.mxu1 %vm3754_vm1, %v3753_v2 }
  0x9c   :  { %3015 = vmatmul.mubr.f32.vlgmr.msra.gmra.mrb[14].mxu0 %v3753_v2 }
  0x9d   :  { %3036 = vmatprep.mubr.msk.f32.mxu0 %vm3754_vm1, %v3753_v2  ;;  %3004 = vmatmul.mubr.msk.f32.gmra.mrb[12].mxu1 %vm146_vm0, %v137_v15 }
  0x9e   :  { %3025 = vmatprep.mubr.msk.f32.mxu1 %vm3754_vm1, %v3753_v2  ;;  %3328 = vmatpush3.bf16.msra.mxu0 %v4017_v20 }
  0x9f   :  { %3329 = vmatprep.subr.bf16.mxu0 %v3755_v7 }
 0x153   :  { %v234_v24 = vpop.f32.mrb[0].mxu0 }
 0x154   :  { %v235_v25 = vadd.f32 %v2740_v23, %v234_v24  ;;  %v2964_v26 = vpop.f32.mrb[1].mxu0 }
 0x156   :  { %269 = vst.msk [vmem:[#allocation2] sm:$0xff] %vm268_vm2, %v235_v25 }
 0x157   :  { %v239_v27 = vpop.f32.mrb[2].mxu0  ;;  %v350_v55 = vpop.f32.mrb[0].mxu1 }
 0x158   :  { %v240_v28 = vadd.f32 %v2740_v23, %v239_v27  ;;  %v2967_v29 = vpop.f32.mrb[3].mxu0  ;;  %v351_v56 = vadd.f32 %v2748_v54, %v350_v55  ;;  %v2987_v57 = vpop.f32.mrb[1].mxu1 }
 0x15a   :  { %270 = vst.msk [vmem:[#allocation2 + $0x8] sm:$0xff] %vm268_vm2, %v240_v28 }
 0x15b   :  { %v244_v30 = vpop.f32.mrb[4].mxu0  ;;  %385 = vst.msk [vmem:[#allocation3] sm:$0xff] %vm384_vm3, %v351_v56 }
 0x15c   :  { %v245_v31 = vadd.f32 %v2740_v23, %v244_v30  ;;  %v2970_v32 = vpop.f32.mrb[5].mxu0  ;;  %v355_v58 = vpop.f32.mrb[2].mxu1 }
 0x15d   :  { %v422_v45 = vld [vmem:[#allocation2] sm:$0xff]  ;;  %v356_v59 = vadd.f32 %v2748_v54, %v355_v58  ;;  %v2990_v60 = vpop.f32.mrb[3].mxu1 }
 0x15e   :  { %271 = vst.msk [vmem:[#allocation2 + $0x10] sm:$0xff] %vm268_vm2, %v245_v31  ;;  %v404_v32 = vld [vmem:[%s4357_s10] sm:$0xff] }
 0x15f   :  { %v249_v33 = vpop.f32.mrb[6].mxu0  ;;  %386 = vst.msk [vmem:[#allocation3 + $0x8] sm:$0xff] %vm384_vm3, %v356_v59 }
 0x160   :  { %v250_v34 = vadd.f32 %v2740_v23, %v249_v33  ;;  %v2973_v35 = vpop.f32.mrb[7].mxu0  ;;  %v360_v61 = vpop.f32.mrb[4].mxu1  ;;  %v405_v33 = vld [vmem:[%s4357_s10 + $0x8] sm:$0xff] }
 0x161   :  { %v361_v62 = vadd.f32 %v2748_v54, %v360_v61  ;;  %v2993_v63 = vpop.f32.mrb[5].mxu1  ;;  %v406_v35 = vld [vmem:[%s4357_s10 + $0x10] sm:$0xff] }
 0x162   :  { %272 = vst.msk [vmem:[#allocation2 + $0x18] sm:$0xff] %vm268_vm2, %v250_v34  ;;  %v503_v25 = vld [vmem:[#allocation3] sm:$0xff]  ;;  %v4044_v34 = vpack.c.bf16 %v405_v33, %v404_v32 }
 0x163   :  { %v254_v36 = vpop.f32.mrb[8].mxu0  ;;  %387 = vst.msk [vmem:[#allocation3 + $0x10] sm:$0xff] %vm384_vm3, %v361_v62 }
 0x164   :  { %v255_v37 = vadd.f32 %v2740_v23, %v254_v36  ;;  %v2976_v38 = vpop.f32.mrb[9].mxu0  ;;  %v365_v0 = vpop.f32.mrb[6].mxu1  ;;  %v407_v36 = vld [vmem:[%s4357_s10 + $0x18] sm:$0xff]  ;;  %s2765_s10 = sld [smem:[#allocation4 + $0x1]] }
 0x165   :  { %v366_v1 = vadd.f32 %v2748_v54, %v365_v0  ;;  %v2996_v3 = vpop.f32.mrb[7].mxu1  ;;  %v4058_v38 = vld [vmem:[#allocation15] ss:$0 sm:$0xff] }
 0x166   :  { %273 = vst.msk [vmem:[#allocation2 + $0x20] sm:$0xff] %vm268_vm2, %v255_v37  ;;  %v4054_v37 = vpack.c.bf16 %v407_v36, %v406_v35  ;;  %v831_v58 = vld [vmem:[#allocation3 + $0x8] sm:$0xff] }
 0x167   :  { %v259_v39 = vpop.f32.mrb[10].mxu0  ;;  %388 = vst.msk [vmem:[#allocation3 + $0x18] sm:$0xff] %vm384_vm3, %v366_v1 }
 0x168   :  { %v260_v40 = vadd.f32 %v2740_v23, %v259_v39  ;;  %v2979_v41 = vpop.f32.mrb[11].mxu0  ;;  %v370_v4 = vpop.f32.mrb[8].mxu1 }
 0x169   :  { %v371_v6 = vadd.f32 %v2748_v54, %v370_v4  ;;  %v2999_v8 = vpop.f32.mrb[9].mxu1 }
 0x16a   :  { %274 = vst.msk [vmem:[#allocation2 + $0x28] sm:$0xff] %vm268_vm2, %v260_v40  ;;  %v984_v8 = vstv %s2765_s10 }
 0x16b   :  { %v264_v42 = vpop.f32.mrb[12].mxu0  ;;  %389 = vst.msk [vmem:[#allocation3 + $0x20] sm:$0xff] %vm384_vm3, %v371_v6 }
 0x16c   :  { %v265_v43 = vadd.f32 %v2740_v23, %v264_v42  ;;  %v2982_v44 = vpop.f32.mrb[13].mxu0  ;;  %v375_v9 = vpop.f32.mrb[10].mxu1  ;;  %v403_v23 = vld [vmem:[%s4355_s8 + $0x18] sm:$0xff]  ;;  %v657_v42 = vstv %s582_s3 }
 0x16d   :  { %v376_v11 = vadd.f32 %v2748_v54, %v375_v9  ;;  %v3002_v12 = vpop.f32.mrb[11].mxu1  ;;  %v4027_v24 = vpack.c.bf16 %v403_v23, %v402_v21 }
 0x16e   :  { %275 = vst.msk [vmem:[#allocation2 + $0x30] sm:$0xff] %vm268_vm2, %v265_v43 }
 0x16f   :  { %v492_v46 = vpop.f32.mrb[14].mxu0  ;;  %390 = vst.msk [vmem:[#allocation3 + $0x28] sm:$0xff] %vm384_vm3, %v376_v11  ;;  %3331 = vmatpush3.bf16.msra.mxu0 %v4027_v24 }
 0x170   :  { %v493_v47 = vadd.f32 %v492_v46, %v422_v45  ;;  %v3016_v48 = vpop.f32.mrb[15].mxu0  ;;  %v380_v13 = vpop.f32.mrb[12].mxu1  ;;  %3338 = vmatprep.subr.bf16.mxu0 %v3755_v7 }
 0x171   :  { %v381_v14 = vadd.f32 %v2748_v54, %v380_v13  ;;  %v3005_v15 = vpop.f32.mrb[13].mxu1 }
 0x172   :  { %v2758_v49 = vmul.f32 -1.442695, %v493_v47  ;;  %v748_v47 = vld [vmem:[#allocation2 + $0x8] sm:$0xff] }
 0x173   :  { %391 = vst.msk [vmem:[#allocation3 + $0x30] sm:$0xff] %vm384_vm3, %v381_v14  ;;  %v1076_v14 = vld [vmem:[#allocation2 + $0x10] sm:$0xff] }
 0x174   :  { %3496 = vpow2.f32 %v2758_v49 }
 0x17e   :  { %v3497_v50 = vpop.eup %3496 }
 0x17f   :  { %v499_v51 = vadd.f32 1.0, %v3497_v50 }
 0x181   :  { %3498 = vrcp.f32 %v499_v51 }
 0x18b   :  { %v3499_v52 = vpop.eup %3498 }
 0x18c   :  { %v502_v53 = vmul.f32 0.0, %v3499_v52  ;;  %v579_v28 = vsub.f32 1.0, %v3499_v52 }
 0x18e   :  { %505 = vrot.lane.b32.xlu0 %v502_v53, %s3756_s4 }
 0x200   :  { %v506_v16 = vpop.permute.xlu0 %505 }
 0x201   :  { %3026 = vmatmul.mubr.msk.f32.vlgmr.msra.gmra.mrb[14].mxu1 %vm384_vm3, %v506_v16 }
 0x202   :  { %3047 = vmatprep.mubr.msk.f32.mxu1 %vm3754_vm1, %v3753_v2  ;;  %3334 = vmatpush3.bf16.msra.mxu1 %v4044_v34 }
 0x203   :  { %3335 = vmatprep.subr.bf16.mxu1 %v3755_v7 }
 0x206   :  { %3337 = vmatpush3.bf16.msra.mxu1 %v4054_v37 }
 0x207   :  { %3344 = vmatprep.subr.bf16.mxu1 %v3755_v7 }
 0x2d4   :  { %v575_v26 = vpop.f32.mrb[14].mxu1 }
 0x2d5   :  { %v576_v27 = vadd.f32 %v575_v26, %v503_v25  ;;  %v3027_v29 = vpop.f32.mrb[15].mxu1 }
 0x2d6   :  { %v1159_v29 = vld [vmem:[#allocation3 + $0x10] sm:$0xff] }
 0x2d7   :  { %v580_v30 = vmul.f32 %v579_v28, %v576_v27 }
 0x2d9   :  { %v581_v31 = vadd.f32 %v580_v30, %v502_v53 }
 0x2db   :  { %3037 = vmatmul.mubr.msk.f32.vlgmr.msra.gmra.mrb[16].mxu0 %vm384_vm3, %v581_v31 }
 0x2dc   :  { %3340 = vmatpush3.bf16.msra.mxu0 %v3918_v5  ;;  %3058 = vmatprep.mubr.msk.f32.mxu0 %vm3754_vm1, %v3753_v2 }
 0x2dd   :  { %3341 = vmatprep.subr.bf16.mxu0 %v3755_v7 }
 0x2e0   :  { %3343 = vmatpush3.bf16.msra.mxu0 %v3932_v10 }
 0x2e1   :  { %3350 = vmatprep.subr.bf16.mxu0 %v3755_v7 }
 0x3ae   :  { %v652_v39 = vpop.f32.mrb[16].mxu0 }
 0x3af   :  { %v653_v40 = vadd.f32 %v4058_v38, %v652_v39  ;;  %v3038_v41 = vpop.f32.mrb[17].mxu0 }
 0x3b1   :  { %3500 = vtanh.f32 %v653_v40 }
 0x3bb   :  { %v3501_v43 = vpop.eup %3500 }
 0x3bc   :  { %v658_v44 = vmul.f32 %v3501_v43, %v657_v42  ;;  %v1312_v43 = vstv %s2772_s26 }
 0x3be   :  { %v659_v45 = vadd.f32 %v658_v44, %v581_v31 }
 0x3c0   :  { %3048 = vmatmul.mubr.msk.f32.vlgmr.msra.gmra.mrb[16].mxu1 %vm384_vm3, %v659_v45  ;;  %746 = vst.msk [vmem:[#allocation17] sm:$0xff] %vm384_vm3, %v659_v45  ;;  %3059 = vmatmul.mubr.msk.f32.vlgmr.msra.gmra.mrb[18].mxu0 %vm384_vm3, %v659_v45 }
 0x3c1   :  { %3346 = vmatpush3.bf16.msra.mxu1 %v3960_v19  ;;  %3069 = vmatprep.mubr.msk.f32.mxu1 %vm3754_vm1, %v3753_v2 }
 0x3c2   :  { %3347 = vmatprep.subr.bf16.mxu1 %v3755_v7  ;;  %3352 = vmatpush3.bf16.msra.mxu0 %v4017_v20 }
 0x3c3   :  { %3353 = vmatprep.subr.bf16.mxu0 %v3755_v7  ;;  %3080 = vmatprep.mubr.msk.f32.mxu0 %vm3754_vm1, %v3753_v2 }
 0x3c5   :  { %3349 = vmatpush3.bf16.msra.mxu1 %v3967_v22 }
 0x3c6   :  { %3355 = vmatpush3.bf16.msra.mxu0 %v4027_v24  ;;  %3356 = vmatprep.subr.bf16.mxu1 %v3755_v7 }
 0x3c7   :  { %3362 = vmatprep.subr.bf16.mxu0 %v3755_v7 }
 0x493   :  { %v4076_v46 = vpop.f32.mrb[16].mxu1  ;;  %v815_v48 = vpop.f32.mrb[18].mxu0 }
 0x494   :  { %v816_v49 = vadd.f32 %v815_v48, %v748_v47  ;;  %v3049_v50 = vpop.f32.mrb[17].mxu1  ;;  %v3060_v51 = vpop.f32.mrb[19].mxu0 }
 0x496   :  { %v2763_v52 = vmul.f32 -1.442695, %v816_v49  ;;  %v1404_v49 = vld [vmem:[#allocation2 + $0x18] sm:$0xff] }
 0x498   :  { %3502 = vpow2.f32 %v2763_v52 }
 0x4a2   :  { %v3503_v53 = vpop.eup %3502 }
 0x4a3   :  { %v822_v54 = vadd.f32 1.0, %v3503_v53 }
 0x4a5   :  { %3504 = vrcp.f32 %v822_v54 }
 0x4af   :  { %v3505_v55 = vpop.eup %3504 }
 0x4b0   :  { %826 = vrot.lane.b32.xlu0 %v3505_v55, %s3756_s4  ;;  %v905_v61 = vsub.f32 1.0, %v3505_v55  ;;  %v907_v0 = vmul.f32 %v3505_v55, %v659_v45 }
 0x522   :  { %v827_v56 = vpop.permute.xlu0 %826 }
 0x523   :  { %v829_v57 = vmul.f32 %v827_v56, %v659_v45 }
 0x525   :  { %3070 = vmatmul.mubr.msk.f32.vlgmr.msra.gmra.mrb[18].mxu1 %vm384_vm3, %v829_v57 }
 0x526   :  { %3358 = vmatpush3.bf16.msra.mxu1 %v4044_v34  ;;  %3091 = vmatprep.mubr.msk.f32.mxu1 %vm3754_vm1, %v3753_v2 }
 0x527   :  { %3359 = vmatprep.subr.bf16.mxu1 %v3755_v7 }
 0x52a   :  { %3361 = vmatpush3.bf16.msra.mxu1 %v4054_v37 }
 0x52b   :  { %3368 = vmatprep.subr.bf16.mxu1 %v3755_v7 }
 0x5f8   :  { %v901_v59 = vpop.f32.mrb[18].mxu1 }
 0x5f9   :  { %v902_v60 = vadd.f32 %v901_v59, %v831_v58  ;;  %v3071_v62 = vpop.f32.mrb[19].mxu1 }
 0x5fb   :  { %v906_v63 = vmul.f32 %v905_v61, %v902_v60  ;;  %v1487_v60 = vld [vmem:[#allocation3 + $0x18] sm:$0xff] }
 0x5fd   :  { %v908_v1 = vadd.f32 %v907_v0, %v906_v63 }
 0x5ff   :  { %3081 = vmatmul.mubr.msk.f32.vlgmr.msra.gmra.mrb[20].mxu0 %vm384_vm3, %v908_v1 }
 0x600   :  { %3364 = vmatpush3.bf16.msra.mxu0 %v3918_v5  ;;  %3102 = vmatprep.mubr.msk.f32.mxu0 %vm3754_vm1, %v3753_v2 }
 0x601   :  { %3365 = vmatprep.subr.bf16.mxu0 %v3755_v7 }
 0x604   :  { %3367 = vmatpush3.bf16.msra.mxu0 %v3932_v10 }
 0x605   :  { %3374 = vmatprep.subr.bf16.mxu0 %v3755_v7 }
 0x6d2   :  { %v979_v3 = vpop.f32.mrb[20].mxu0 }
 0x6d3   :  { %v980_v4 = vadd.f32 %v4058_v38, %v979_v3  ;;  %v3082_v6 = vpop.f32.mrb[21].mxu0 }
 0x6d5   :  { %3506 = vtanh.f32 %v980_v4 }
 0x6df   :  { %v3507_v9 = vpop.eup %3506 }
 0x6e0   :  { %v985_v11 = vmul.f32 %v3507_v9, %v984_v8 }
 0x6e2   :  { %v986_v12 = vadd.f32 %v985_v11, %v908_v1  ;;  %v1640_v11 = vstv %s2779_s16 }
 0x6e4   :  { %3092 = vmatmul.mubr.msk.f32.vlgmr.msra.gmra.mrb[20].mxu1 %vm384_vm3, %v986_v12  ;;  %1074 = vst.msk [vmem:[#allocation17 + $0x8] sm:$0xff] %vm384_vm3, %v986_v12  ;;  %3103 = vmatmul.mubr.msk.f32.vlgmr.msra.gmra.mrb[22].mxu0 %vm384_vm3, %v986_v12 }
 0x6e5   :  { %3370 = vmatpush3.bf16.msra.mxu1 %v3960_v19  ;;  %3113 = vmatprep.mubr.msk.f32.mxu1 %vm3754_vm1, %v3753_v2 }
 0x6e6   :  { %3371 = vmatprep.subr.bf16.mxu1 %v3755_v7  ;;  %3376 = vmatpush3.bf16.msra.mxu0 %v4017_v20 }
 0x6e7   :  { %3377 = vmatprep.subr.bf16.mxu0 %v3755_v7  ;;  %3124 = vmatprep.mubr.msk.f32.mxu0 %vm3754_vm1, %v3753_v2 }
 0x6e9   :  { %3373 = vmatpush3.bf16.msra.mxu1 %v3967_v22 }
 0x6ea   :  { %3379 = vmatpush3.bf16.msra.mxu0 %v4027_v24  ;;  %3380 = vmatprep.subr.bf16.mxu1 %v3755_v7 }
 0x6eb   :  { %3386 = vmatprep.subr.bf16.mxu0 %v3755_v7 }
 0x7b7   :  { %v4109_v13 = vpop.f32.mrb[20].mxu1  ;;  %v1143_v15 = vpop.f32.mrb[22].mxu0 }
 0x7b8   :  { %v1144_v16 = vadd.f32 %v1143_v15, %v1076_v14  ;;  %v3093_v17 = vpop.f32.mrb[21].mxu1  ;;  %v3104_v18 = vpop.f32.mrb[23].mxu0 }
 0x7b9   :  { %v1732_v17 = vld [vmem:[#allocation2 + $0x20] sm:$0xff] }
 0x7ba   :  { %v2770_v21 = vmul.f32 -1.442695, %v1144_v16 }
 0x7bc   :  { %3508 = vpow2.f32 %v2770_v21 }
 0x7c6   :  { %v3509_v23 = vpop.eup %3508 }
 0x7c7   :  { %v1150_v25 = vadd.f32 1.0, %v3509_v23 }
 0x7c9   :  { %3510 = vrcp.f32 %v1150_v25 }
 0x7d3   :  { %v3511_v26 = vpop.eup %3510 }
 0x7d4   :  { %1154 = vrot.lane.b32.xlu1 %v3511_v26, %s3756_s4  ;;  %v1233_v32 = vsub.f32 1.0, %v3511_v26  ;;  %v1235_v36 = vmul.f32 %v3511_v26, %v986_v12 }
 0x846   :  { %v1155_v27 = vpop.permute.xlu1 %1154 }
 0x847   :  { %v1157_v28 = vmul.f32 %v1155_v27, %v986_v12 }
 0x849   :  { %3114 = vmatmul.mubr.msk.f32.vlgmr.msra.gmra.mrb[22].mxu1 %vm384_vm3, %v1157_v28 }
 0x84a   :  { %3382 = vmatpush3.bf16.msra.mxu1 %v4044_v34  ;;  %3135 = vmatprep.mubr.msk.f32.mxu1 %vm3754_vm1, %v3753_v2 }
 0x84b   :  { %3383 = vmatprep.subr.bf16.mxu1 %v3755_v7 }
 0x84e   :  { %3385 = vmatpush3.bf16.msra.mxu1 %v4054_v37 }
 0x84f   :  { %3392 = vmatprep.subr.bf16.mxu1 %v3755_v7 }
 0x91c   :  { %v1229_v30 = vpop.f32.mrb[22].mxu1 }
 0x91d   :  { %v1230_v31 = vadd.f32 %v1229_v30, %v1159_v29  ;;  %v3115_v33 = vpop.f32.mrb[23].mxu1 }
 0x91f   :  { %v1234_v35 = vmul.f32 %v1233_v32, %v1230_v31  ;;  %v1815_v32 = vld [vmem:[#allocation3 + $0x20] sm:$0xff] }
 0x921   :  { %v1236_v39 = vadd.f32 %v1235_v36, %v1234_v35 }
 0x923   :  { %3125 = vmatmul.mubr.msk.f32.vlgmr.msra.gmra.mrb[24].mxu0 %vm384_vm3, %v1236_v39 }
 0x924   :  { %3388 = vmatpush3.bf16.msra.mxu0 %v3918_v5  ;;  %3146 = vmatprep.mubr.msk.f32.mxu0 %vm3754_vm1, %v3753_v2 }
 0x925   :  { %3389 = vmatprep.subr.bf16.mxu0 %v3755_v7 }
 0x928   :  { %3391 = vmatpush3.bf16.msra.mxu0 %v3932_v10 }
 0x929   :  { %3398 = vmatprep.subr.bf16.mxu0 %v3755_v7 }
 0x9f6   :  { %v1307_v40 = vpop.f32.mrb[24].mxu0 }
 0x9f7   :  { %v1308_v41 = vadd.f32 %v4058_v38, %v1307_v40  ;;  %v3126_v42 = vpop.f32.mrb[25].mxu0 }
 0x9f9   :  { %3512 = vtanh.f32 %v1308_v41 }
 0xa03   :  { %v3513_v44 = vpop.eup %3512 }
 0xa04   :  { %v1313_v45 = vmul.f32 %v3513_v44, %v1312_v43 }
 0xa06   :  { %v1314_v47 = vadd.f32 %v1313_v45, %v1236_v39 }
 0xa08   :  { %3136 = vmatmul.mubr.msk.f32.vlgmr.msra.gmra.mrb[24].mxu1 %vm384_vm3, %v1314_v47  ;;  %1402 = vst.msk [vmem:[#allocation17 + $0x10] sm:$0xff] %vm384_vm3, %v1314_v47  ;;  %3147 = vmatmul.mubr.msk.f32.vlgmr.msra.gmra.mrb[26].mxu0 %vm384_vm3, %v1314_v47 }
 0xa09   :  { %3394 = vmatpush3.bf16.msra.mxu1 %v3960_v19  ;;  %3157 = vmatprep.mubr.msk.f32.mxu1 %vm3754_vm1, %v3753_v2 }
 0xa0a   :  { %3395 = vmatprep.subr.bf16.mxu1 %v3755_v7  ;;  %3400 = vmatpush3.bf16.msra.mxu0 %v4017_v20 }
 0xa0b   :  { %3401 = vmatprep.subr.bf16.mxu0 %v3755_v7  ;;  %3168 = vmatprep.mubr.msk.f32.mxu0 %vm3754_vm1, %v3753_v2 }
 0xa0d   :  { %3397 = vmatpush3.bf16.msra.mxu1 %v3967_v22 }
 0xa0e   :  { %3403 = vmatpush3.bf16.msra.mxu0 %v4027_v24  ;;  %3404 = vmatprep.subr.bf16.mxu1 %v3755_v7 }
 0xa0f   :  { %3410 = vmatprep.subr.bf16.mxu0 %v3755_v7 }
 0xadb   :  { %v4142_v48 = vpop.f32.mrb[24].mxu1  ;;  %v1471_v50 = vpop.f32.mrb[26].mxu0 }
 0xadc   :  { %v1472_v51 = vadd.f32 %v1471_v50, %v1404_v49  ;;  %v3137_v52 = vpop.f32.mrb[25].mxu1  ;;  %v3148_v53 = vpop.f32.mrb[27].mxu0 }
 0xadd   :  { %v2060_v53 = vld [vmem:[#allocation2 + $0x28] sm:$0xff] }
 0xade   :  { %v2777_v54 = vmul.f32 -1.442695, %v1472_v51 }
 0xae0   :  { %3514 = vpow2.f32 %v2777_v54 }
 0xaea   :  { %v3515_v55 = vpop.eup %3514 }
 0xaeb   :  { %v1478_v56 = vadd.f32 1.0, %v3515_v55 }
 0xaed   :  { %3516 = vrcp.f32 %v1478_v56 }
 0xaf7   :  { %v3517_v57 = vpop.eup %3516 }
 0xaf8   :  { %1482 = vrot.lane.b32.xlu1 %v3517_v57, %s3756_s4  ;;  %v1561_v63 = vsub.f32 1.0, %v3517_v57  ;;  %v1563_v3 = vmul.f32 %v3517_v57, %v1314_v47 }
 0xb6a   :  { %v1483_v58 = vpop.permute.xlu1 %1482 }
 0xb6b   :  { %v1485_v59 = vmul.f32 %v1483_v58, %v1314_v47  ;;  %v1968_v47 = vstv %s2786_s18 }
 0xb6d   :  { %3158 = vmatmul.mubr.msk.f32.vlgmr.msra.gmra.mrb[26].mxu1 %vm384_vm3, %v1485_v59 }
 0xb6e   :  { %3406 = vmatpush3.bf16.msra.mxu1 %v4044_v34  ;;  %3179 = vmatprep.mubr.msk.f32.mxu1 %vm3754_vm1, %v3753_v2 }
 0xb6f   :  { %3407 = vmatprep.subr.bf16.mxu1 %v3755_v7 }
 0xb72   :  { %3409 = vmatpush3.bf16.msra.mxu1 %v4054_v37 }
 0xb73   :  { %3416 = vmatprep.subr.bf16.mxu1 %v3755_v7 }
 0xc40   :  { %v1557_v61 = vpop.f32.mrb[26].mxu1 }
 0xc41   :  { %v1558_v62 = vadd.f32 %v1557_v61, %v1487_v60  ;;  %v3159_v0 = vpop.f32.mrb[27].mxu1 }
 0xc43   :  { %v1562_v1 = vmul.f32 %v1561_v63, %v1558_v62  ;;  %v4214_v62 = vld [vmem:[%s4358_s11] ss:$0 sm:$0xff]  ;;  %s2793_s11 = sld [smem:[#allocation4 + $0x5]] }
 0xc44   :  { %v730_v63 = vadd.f32 %v4214_v62, %v4076_v46  ;;  %v2143_v46 = vld [vmem:[#allocation3 + $0x28] sm:$0xff] }
 0xc45   :  { %v1564_v4 = vadd.f32 %v1563_v3, %v1562_v1 }
 0xc46   :  { %v734_v1 = vsel %vm733_vm4, %v730_v63, -inf }
 0xc47   :  { %3169 = vmatmul.mubr.msk.f32.vlgmr.msra.gmra.mrb[28].mxu0 %vm384_vm3, %v1564_v4 }
 0xc48   :  { %3412 = vmatpush3.bf16.msra.mxu0 %v3918_v5  ;;  %3190 = vmatprep.mubr.msk.f32.mxu0 %vm3754_vm1, %v3753_v2 }
 0xc49   :  { %3413 = vmatprep.subr.bf16.mxu0 %v3755_v7 }
 0xc4c   :  { %3415 = vmatpush3.bf16.msra.mxu0 %v3932_v10 }
 0xc4d   :  { %3422 = vmatprep.subr.bf16.mxu0 %v3755_v7 }
 0xd1a   :  { %v1635_v6 = vpop.f32.mrb[28].mxu0 }
 0xd1b   :  { %v1636_v8 = vadd.f32 %v4058_v38, %v1635_v6  ;;  %v3170_v9 = vpop.f32.mrb[29].mxu0 }
 0xd1d   :  { %3518 = vtanh.f32 %v1636_v8 }
 0xd27   :  { %v3519_v12 = vpop.eup %3518 }
 0xd28   :  { %v1641_v14 = vmul.f32 %v3519_v12, %v1640_v11 }
 0xd2a   :  { %v1642_v15 = vadd.f32 %v1641_v14, %v1564_v4 }
 0xd2c   :  { %3180 = vmatmul.mubr.msk.f32.vlgmr.msra.gmra.mrb[28].mxu1 %vm384_vm3, %v1642_v15  ;;  %1730 = vst.msk [vmem:[#allocation17 + $0x18] sm:$0xff] %vm384_vm3, %v1642_v15  ;;  %3191 = vmatmul.mubr.msk.f32.vlgmr.msra.gmra.mrb[30].mxu0 %vm384_vm3, %v1642_v15 }
 0xd2d   :  { %3418 = vmatpush3.bf16.msra.mxu1 %v3960_v19  ;;  %3201 = vmatprep.mubr.msk.f32.mxu1 %vm3754_vm1, %v3753_v2 }
 0xd2e   :  { %3419 = vmatprep.subr.bf16.mxu1 %v3755_v7  ;;  %3424 = vmatpush3.bf16.msra.mxu0 %v4017_v20 }
 0xd2f   :  { %3425 = vmatprep.subr.bf16.mxu0 %v3755_v7  ;;  %3212 = vmatprep.mubr.msk.f32.mxu0 %vm3754_vm1, %v3753_v2 }
 0xd31   :  { %3421 = vmatpush3.bf16.msra.mxu1 %v3967_v22 }
 0xd32   :  { %3427 = vmatpush3.bf16.msra.mxu0 %v4027_v24  ;;  %3428 = vmatprep.subr.bf16.mxu1 %v3755_v7 }
 0xd33   :  { %3434 = vmatprep.subr.bf16.mxu0 %v3755_v7 }
 0xdff   :  { %v4175_v16 = vpop.f32.mrb[28].mxu1  ;;  %v1799_v18 = vpop.f32.mrb[30].mxu0 }
 0xe00   :  { %v1800_v21 = vadd.f32 %v1799_v18, %v1732_v17  ;;  %v3181_v23 = vpop.f32.mrb[29].mxu1  ;;  %v3192_v25 = vpop.f32.mrb[31].mxu0  ;;  %v4220_v0 = vadd.f32 %v4214_v62, %v4175_v16 }
 0xe01   :  { %v2296_v23 = vstv %s2793_s11 }
 0xe02   :  { %v2784_v26 = vmul.f32 -1.442695, %v1800_v21  ;;  %v1716_v3 = vsel %vm733_vm4, %v4220_v0, -inf }
 0xe04   :  { %3520 = vpow2.f32 %v2784_v26 }
 0xe0e   :  { %v3521_v27 = vpop.eup %3520 }
 0xe0f   :  { %v1806_v28 = vadd.f32 1.0, %v3521_v27 }
 0xe11   :  { %3522 = vrcp.f32 %v1806_v28 }
 0xe1b   :  { %v3523_v29 = vpop.eup %3522 }
 0xe1c   :  { %1810 = vrot.lane.b32.xlu0 %v3523_v29, %s3756_s4  ;;  %v1889_v36 = vsub.f32 1.0, %v3523_v29  ;;  %v1891_v41 = vmul.f32 %v3523_v29, %v1642_v15  ;;  %v2388_v29 = vld [vmem:[#allocation2 + $0x30] sm:$0xff] }
 0xe8e   :  { %v1811_v30 = vpop.permute.xlu0 %1810 }
 0xe8f   :  { %v1813_v31 = vmul.f32 %v1811_v30, %v1642_v15 }
 0xe91   :  { %3202 = vmatmul.mubr.msk.f32.vlgmr.msra.gmra.mrb[30].mxu1 %vm384_vm3, %v1813_v31 }
 0xe92   :  { %3430 = vmatpush3.bf16.msra.mxu1 %v4044_v34  ;;  %3223 = vmatprep.mubr.msk.f32.mxu1 %vm3754_vm1, %v3753_v2 }
 0xe93   :  { %3431 = vmatprep.subr.bf16.mxu1 %v3755_v7 }
 0xe96   :  { %3433 = vmatpush3.bf16.msra.mxu1 %v4054_v37 }
 0xe97   :  { %3440 = vmatprep.subr.bf16.mxu1 %v3755_v7 }
 0xf64   :  { %v1885_v33 = vpop.f32.mrb[30].mxu1 }
 0xf65   :  { %v1886_v35 = vadd.f32 %v1885_v33, %v1815_v32  ;;  %v3203_v39 = vpop.f32.mrb[31].mxu1 }
 0xf67   :  { %v1890_v40 = vmul.f32 %v1889_v36, %v1886_v35 }
 0xf69   :  { %v1892_v42 = vadd.f32 %v1891_v41, %v1890_v40 }
 0xf6b   :  { %3213 = vmatmul.mubr.msk.f32.vlgmr.msra.gmra.mrb[32].mxu0 %vm384_vm3, %v1892_v42 }
 0xf6c   :  { %3436 = vmatpush3.bf16.msra.mxu0 %v3918_v5  ;;  %3234 = vmatprep.mubr.msk.f32.mxu0 %vm3754_vm1, %v3753_v2 }
 0xf6d   :  { %3437 = vmatprep.subr.bf16.mxu0 %v3755_v7 }
 0xf70   :  { %3439 = vmatpush3.bf16.msra.mxu0 %v3932_v10 }
 0xf71   :  { %3446 = vmatprep.subr.bf16.mxu0 %v3755_v7 }
0x103e   :  { %v1963_v43 = vpop.f32.mrb[32].mxu0 }
0x103f   :  { %v1964_v44 = vadd.f32 %v4058_v38, %v1963_v43  ;;  %v3214_v45 = vpop.f32.mrb[33].mxu0  ;;  %v1385_v43 = vadd.f32 %v4214_v62, %v4142_v48 }
0x1041   :  { %3524 = vtanh.f32 %v1964_v44 }
0x104b   :  { %v3525_v49 = vpop.eup %3524 }
0x104c   :  { %v1969_v50 = vmul.f32 %v3525_v49, %v1968_v47  ;;  %v1388_v47 = vsel %vm733_vm4, %v1385_v43, -inf }
0x104e   :  { %v1970_v51 = vadd.f32 %v1969_v50, %v1892_v42  ;;  %v4268_v42 = vadd.f32 %v4214_v62, %v4109_v13 }
0x1050   :  { %3224 = vmatmul.mubr.msk.f32.vlgmr.msra.gmra.mrb[32].mxu1 %vm384_vm3, %v1970_v51  ;;  %2058 = vst.msk [vmem:[#allocation17 + $0x20] sm:$0xff] %vm384_vm3, %v1970_v51  ;;  %3235 = vmatmul.mubr.msk.f32.vlgmr.msra.gmra.mrb[34].mxu0 %vm384_vm3, %v1970_v51  ;;  %v1060_v44 = vsel %vm733_vm4, %v4268_v42, -inf }
0x1051   :  { %3442 = vmatpush3.bf16.msra.mxu1 %v3960_v19  ;;  %3245 = vmatprep.mubr.msk.f32.mxu1 %vm3754_vm1, %v3753_v2 }
0x1052   :  { %3443 = vmatprep.subr.bf16.mxu1 %v3755_v7  ;;  %3448 = vmatpush3.bf16.msra.mxu0 %v4017_v20 }
0x1053   :  { %3449 = vmatprep.subr.bf16.mxu0 %v3755_v7  ;;  %3256 = vmatprep.mubr.msk.f32.mxu0 %vm3754_vm1, %v3753_v2 }
0x1055   :  { %3445 = vmatpush3.bf16.msra.mxu1 %v3967_v22 }
0x1056   :  { %3451 = vmatpush3.bf16.msra.mxu0 %v4027_v24  ;;  %3452 = vmatprep.subr.bf16.mxu1 %v3755_v7 }
0x1057   :  { %3458 = vmatprep.subr.bf16.mxu0 %v3755_v7 }
0x1123   :  { %v4208_v52 = vpop.f32.mrb[32].mxu1  ;;  %v2127_v54 = vpop.f32.mrb[34].mxu0 }
0x1124   :  { %v2128_v55 = vadd.f32 %v2127_v54, %v2060_v53  ;;  %v3225_v56 = vpop.f32.mrb[33].mxu1  ;;  %v3236_v57 = vpop.f32.mrb[35].mxu0  ;;  %v2041_v45 = vadd.f32 %v4214_v62, %v4208_v52 }
0x1126   :  { %v2791_v58 = vmul.f32 -1.442695, %v2128_v55  ;;  %v2044_v49 = vsel %vm733_vm4, %v2041_v45, -inf }
0x1128   :  { %3526 = vpow2.f32 %v2791_v58 }
0x1132   :  { %v3527_v59 = vpop.eup %3526 }
0x1133   :  { %v2134_v60 = vadd.f32 1.0, %v3527_v59 }
0x1135   :  { %3528 = vrcp.f32 %v2134_v60 }
0x113f   :  { %v3529_v61 = vpop.eup %3528 }
0x1140   :  { %2138 = vrot.lane.b32.xlu1 %v3529_v61, %s3756_s4  ;;  %v2217_v11 = vsub.f32 1.0, %v3529_v61  ;;  %v2219_v15 = vmul.f32 %v3529_v61, %v1970_v51 }
0x1164   :  { %735 = vmax.xlane.f32.xlu1 %v734_v1 }
0x1168   :  { %1717 = vmax.xlane.f32.xlu1 %v1716_v3 }
0x11b2   :  { %v2139_v4 = vpop.permute.xlu1 %2138 }
0x11b3   :  { %v2141_v6 = vmul.f32 %v2139_v4, %v1970_v51 }
0x11b5   :  { %3246 = vmatmul.mubr.msk.f32.vlgmr.msra.gmra.mrb[34].mxu1 %vm384_vm3, %v2141_v6 }
0x11b6   :  { %3454 = vmatpush3.bf16.msra.mxu1 %v4044_v34  ;;  %3267 = vmatprep.mubr.msk.f32.mxu1 %vm3754_vm1, %v3753_v2 }
0x11b7   :  { %3455 = vmatprep.subr.bf16.mxu1 %v3755_v7 }
0x11ba   :  { %3457 = vmatpush3.bf16.msra.mxu1 %v4054_v37 }
0x11bb   :  { %3464 = vmatprep.subr.bf16.mxu1 %v3755_v7 }
0x1288   :  { %v2213_v8 = vpop.f32.mrb[34].mxu1 }
0x1289   :  { %v2214_v9 = vadd.f32 %v2213_v8, %v2143_v46  ;;  %v3247_v12 = vpop.f32.mrb[35].mxu1 }
0x128b   :  { %v2218_v14 = vmul.f32 %v2217_v11, %v2214_v9 }
0x128d   :  { %v2220_v16 = vadd.f32 %v2219_v15, %v2218_v14 }
0x128f   :  { %3257 = vmatmul.mubr.msk.f32.vlgmr.msra.gmra.mrb[36].mxu0 %vm384_vm3, %v2220_v16 }
0x1290   :  { %3460 = vmatpush3.bf16.msra.mxu0 %v3918_v5  ;;  %3278 = vmatprep.mubr.msk.f32.mxu0 %vm3754_vm1, %v3753_v2  ;;  %v736_v5 = vpop.xlane.xlu1 %735 }
0x1291   :  { %3461 = vmatprep.subr.bf16.mxu0 %v3755_v7 }
0x1294   :  { %3463 = vmatpush3.bf16.msra.mxu0 %v3932_v10  ;;  %v737_v10 = vsub.f32 %v730_v63, %v736_v5  ;;  %v1718_v50 = vpop.xlane.xlu1 %1717  ;;  %v2471_v63 = vld [vmem:[#allocation3 + $0x30] sm:$0xff] }
0x1295   :  { %3470 = vmatprep.subr.bf16.mxu0 %v3755_v7 }
0x1362   :  { %v2291_v17 = vpop.f32.mrb[36].mxu0 }
0x1363   :  { %v2292_v18 = vadd.f32 %v4058_v38, %v2291_v17  ;;  %v3258_v21 = vpop.f32.mrb[37].mxu0 }
0x1365   :  { %3530 = vtanh.f32 %v2292_v18 }
0x136f   :  { %v3531_v25 = vpop.eup %3530 }
0x1370   :  { %v2297_v26 = vmul.f32 %v3531_v25, %v2296_v23  ;;  %v2624_v25 = vstv %s2800_s6 }
0x1372   :  { %v4240_v27 = vadd.f32 %v2297_v26, %v2220_v16 }
0x1374   :  { %3268 = vmatmul.mubr.msk.f32.vlgmr.msra.gmra.mrb[36].mxu1 %vm384_vm3, %v4240_v27  ;;  %2386 = vst.msk [vmem:[#allocation17 + $0x28] sm:$0xff] %vm384_vm3, %v4240_v27  ;;  %3279 = vmatmul.mubr.msk.f32.vlgmr.msra.gmra.mrb[38].mxu0 %vm384_vm3, %v4240_v27 }
0x1375   :  { %3466 = vmatpush3.bf16.msra.mxu1 %v3960_v19  ;;  %3289 = vmatprep.mubr.msk.f32.mxu1 %vm3754_vm1, %v3753_v2  ;;  %v738_v19 = vmul.f32 1.442695, %v737_v10 }
0x1376   :  { %3467 = vmatprep.subr.bf16.mxu1 %v3755_v7  ;;  %3472 = vmatpush3.bf16.msra.mxu0 %v4017_v20 }
0x1377   :  { %3473 = vmatprep.subr.bf16.mxu0 %v3755_v7  ;;  %3300 = vmatprep.mubr.msk.f32.mxu0 %vm3754_vm1, %v3753_v2  ;;  %3532 = vpow2.f32 %v738_v19  ;;  %v1719_v19 = vsub.f32 %v4220_v0, %v1718_v50 }
0x1379   :  { %3469 = vmatpush3.bf16.msra.mxu1 %v3967_v22 }
0x137a   :  { %3475 = vmatpush3.bf16.msra.mxu0 %v4027_v24  ;;  %3476 = vmatprep.subr.bf16.mxu1 %v3755_v7 }
0x1381   :  { %v3533_v24 = vpop.eup %3532 }
0x1382   :  { %v740_v36 = vsel %vm733_vm4, %v3533_v24, 0.0 }
0x1447   :  { %v2368_v28 = vpop.f32.mrb[36].mxu1  ;;  %v2455_v30 = vpop.f32.mrb[38].mxu0 }
0x1448   :  { %v4260_v20 = vadd.f32 %v4214_v62, %v2368_v28  ;;  %v2456_v31 = vadd.f32 %v2455_v30, %v2388_v29  ;;  %v3269_v32 = vpop.f32.mrb[37].mxu1  ;;  %v3280_v33 = vpop.f32.mrb[39].mxu0  ;;  %v1720_v29 = vmul.f32 1.442695, %v1719_v19 }
0x144a   :  { %v2798_v35 = vmul.f32 -1.442695, %v2456_v31  ;;  %v2372_v22 = vsel %vm733_vm4, %v4260_v20, -inf }
0x144b   :  { %2373 = vmax.xlane.f32.xlu1 %v2372_v22 }
0x144c   :  { %3534 = vpow2.f32 %v2798_v35 }
0x144f   :  { %741 = vadd.xlane.f32.xlu1 %v740_v36 }
0x1456   :  { %v3535_v39 = vpop.eup %3534 }
0x1457   :  { %v2462_v40 = vadd.f32 1.0, %v3535_v39 }
0x1459   :  { %3536 = vrcp.f32 %v2462_v40 }
0x1463   :  { %v3537_v41 = vpop.eup %3536 }
0x1464   :  { %2466 = vrot.lane.b32.xlu0 %v3537_v41, %s3756_s4  ;;  %v2545_v4 = vsub.f32 1.0, %v3537_v41  ;;  %v2547_v8 = vmul.f32 %v3537_v41, %v4240_v27 }
0x1483   :  { %1061 = vmax.xlane.f32.xlu0 %v1060_v44 }
0x1487   :  { %1389 = vmax.xlane.f32.xlu0 %v1388_v47 }
0x148b   :  { %2045 = vmax.xlane.f32.xlu0 %v2044_v49 }
0x14d6   :  { %v2467_v51 = vpop.permute.xlu0 %2466 }
0x14d7   :  { %v2469_v13 = vmul.f32 %v2467_v51, %v4240_v27 }
0x14d8   :  { %v4279_v53 = vpop.xlane.xlu1 %2373 }
0x14d9   :  { %3290 = vmatmul.mubr.msk.f32.vlgmr.msra.gmra.mrb[38].mxu1 %vm384_vm3, %v2469_v13 }
0x14da   :  { %3478 = vmatpush3.bf16.msra.mxu1 %v4044_v34  ;;  %3311 = vmatprep.mubr.msk.f32.mxu1 %vm3754_vm1, %v3753_v2 }
0x14db   :  { %3479 = vmatprep.subr.bf16.mxu1 %v3755_v7 }
0x14dc   :  { %v742_v48 = vpop.xlane.xlu1 %741 }
0x14dd   :  { %3538 = vrcp.f32 %v742_v48 }
0x14de   :  { %3481 = vmatpush3.bf16.msra.mxu1 %v4054_v37 }
0x14e7   :  { %v3539_v52 = vpop.eup %3538 }
0x14e8   :  { %v744_v54 = vmul.f32 %v3539_v52, %v3533_v24 }
0x14ea   :  { %745 = vst.msk [vmem:[%s4359_s12] sm:$0xff] %vm733_vm4, %v744_v54 }
0x1510   :  { %v1062_v55 = vpop.xlane.xlu0 %1061 }
0x1511   :  { %v1063_v10 = vsub.f32 %v4268_v42, %v1062_v55 }
0x1513   :  { %v1064_v28 = vmul.f32 1.442695, %v1063_v10 }
0x1514   :  { %v1390_v56 = vpop.xlane.xlu0 %1389 }
0x1515   :  { %v1391_v57 = vsub.f32 %v1385_v43, %v1390_v56 }
0x1517   :  { %v1392_v34 = vmul.f32 1.442695, %v1391_v57 }
0x1518   :  { %v2046_v58 = vpop.xlane.xlu0 %2045 }
0x1519   :  { %3540 = vpow2.f32 %v1392_v34  ;;  %v2047_v2 = vsub.f32 %v2041_v45, %v2046_v58 }
0x151b   :  { %v2048_v59 = vmul.f32 1.442695, %v2047_v2 }
0x151d   :  { %3542 = vpow2.f32 %v2048_v59 }
0x1523   :  { %v3541_v7 = vpop.eup %3540 }
0x1524   :  { %v1394_v60 = vsel %vm733_vm4, %v3541_v7, 0.0 }
0x1525   :  { %1395 = vadd.xlane.f32.xlu1 %v1394_v60 }
0x1527   :  { %v3543_v37 = vpop.eup %3542 }
0x1528   :  { %v2050_v61 = vsel %vm733_vm4, %v3543_v37, 0.0 }
0x1529   :  { %2051 = vadd.xlane.f32.xlu1 %v2050_v61 }
0x15ac   :  { %v2541_v1 = vpop.f32.mrb[38].mxu1 }
0x15ad   :  { %v2542_v3 = vadd.f32 %v2541_v1, %v2471_v63  ;;  %v3291_v6 = vpop.f32.mrb[39].mxu1 }
0x15af   :  { %v2546_v46 = vmul.f32 %v2545_v4, %v2542_v3 }
0x15b1   :  { %v2548_v9 = vadd.f32 %v2547_v8, %v2546_v46 }
0x15b2   :  { %v1396_v11 = vpop.xlane.xlu1 %1395 }
0x15b3   :  { %3544 = vrcp.f32 %v1396_v11  ;;  %3301 = vmatmul.mubr.msk.f32.vlgmr.msra.gmra.mrb[40].mxu0 %vm384_vm3, %v2548_v9 }
0x15b6   :  { %v2052_v12 = vpop.xlane.xlu1 %2051 }
0x15b7   :  { %3546 = vrcp.f32 %v2052_v12 }
0x15bd   :  { %v3545_v14 = vpop.eup %3544 }
0x15be   :  { %v1398_v15 = vmul.f32 %v3545_v14, %v3541_v7 }
0x15c0   :  { %2775 = vst.msk [vmem:[%s4359_s12 + $0x10] sm:$0xff] %vm733_vm4, %v1398_v15 }
0x15c1   :  { %v3547_v16 = vpop.eup %3546 }
0x15c2   :  { %v2054_v17 = vmul.f32 %v3547_v16, %v3543_v37 }
0x15c4   :  { %2789 = vst.msk [vmem:[%s4359_s12 + $0x20] sm:$0xff] %vm733_vm4, %v2054_v17 }
0x1686   :  { %v2619_v18 = vpop.f32.mrb[40].mxu0 }
0x1687   :  { %v2620_v21 = vadd.f32 %v4058_v38, %v2619_v18  ;;  %v3302_v23 = vpop.f32.mrb[41].mxu0  ;;  %v2375_v38 = vsub.f32 %v4260_v20, %v4279_v53 }
0x1689   :  { %3548 = vtanh.f32 %v2620_v21  ;;  %v2376_v30 = vmul.f32 1.442695, %v2375_v38 }
0x168a   :  { %3550 = vpow2.f32 %v1064_v28 }
0x168b   :  { %3552 = vpow2.f32 %v1720_v29 }
0x168c   :  { %3554 = vpow2.f32 %v2376_v30 }
0x1693   :  { %v3549_v26 = vpop.eup %3548 }
0x1694   :  { %v2625_v27 = vmul.f32 %v3549_v26, %v2624_v25  ;;  %v3551_v22 = vpop.eup %3550 }
0x1695   :  { %v1066_v24 = vsel %vm733_vm4, %v3551_v22, 0.0  ;;  %v3553_v0 = vpop.eup %3552 }
0x1696   :  { %v2626_v5 = vadd.f32 %v2625_v27, %v2548_v9  ;;  %v1722_v36 = vsel %vm733_vm4, %v3553_v0, 0.0  ;;  %v3555_v39 = vpop.eup %3554 }
0x1697   :  { %v2378_v20 = vsel %vm733_vm4, %v3555_v39, 0.0 }
0x1698   :  { %3312 = vmatmul.mubr.msk.f32.vlgmr.msra.gmra.mrb[40].mxu1 %vm384_vm3, %v2626_v5  ;;  %2714 = vst.msk [vmem:[#allocation17 + $0x30] sm:$0xff] %vm384_vm3, %v2626_v5 }
0x176b   :  { %v2696_v31 = vpop.f32.mrb[40].mxu1 }
0x176c   :  { %v2697_v32 = vadd.f32 %v4214_v62, %v2696_v31  ;;  %v3313_v33 = vpop.f32.mrb[41].mxu1 }
0x176e   :  { %v2700_v35 = vsel %vm733_vm4, %v2697_v32, -inf }
0x176f   :  { %2701 = vmax.xlane.f32.xlu0 %v2700_v35 }
0x1773   :  { %1067 = vadd.xlane.f32.xlu0 %v1066_v24 }
0x1777   :  { %1723 = vadd.xlane.f32.xlu0 %v1722_v36 }
0x177b   :  { %2379 = vadd.xlane.f32.xlu0 %v2378_v20 }
0x17fc   :  { %v2702_v40 = vpop.xlane.xlu0 %2701 }
0x17fd   :  { %v2703_v41 = vsub.f32 %v2697_v32, %v2702_v40 }
0x17ff   :  { %v2704_v62 = vmul.f32 1.442695, %v2703_v41 }
0x1800   :  { %v1068_v42 = vpop.xlane.xlu0 %1067 }
0x1801   :  { %3556 = vpow2.f32 %v2704_v62 }
0x1802   :  { %3558 = vrcp.f32 %v1068_v42 }
0x1804   :  { %v1724_v43 = vpop.xlane.xlu0 %1723 }
0x1805   :  { %3560 = vrcp.f32 %v1724_v43 }
0x1808   :  { %v2380_v44 = vpop.xlane.xlu0 %2379 }
0x1809   :  { %3562 = vrcp.f32 %v2380_v44 }
0x180b   :  { %v3557_v45 = vpop.eup %3556 }
0x180c   :  { %v3559_v47 = vpop.eup %3558  ;;  %v2706_v49 = vsel %vm733_vm4, %v3557_v45, 0.0 }
0x180d   :  { %v1070_v50 = vmul.f32 %v3559_v47, %v3551_v22  ;;  %2707 = vadd.xlane.f32.xlu1 %v2706_v49 }
0x180f   :  { %v3561_v51 = vpop.eup %3560  ;;  %2768 = vst.msk [vmem:[%s4359_s12 + $0x8] sm:$0xff] %vm733_vm4, %v1070_v50 }
0x1810   :  { %v1726_v13 = vmul.f32 %v3561_v51, %v3553_v0 }
0x1812   :  { %2782 = vst.msk [vmem:[%s4359_s12 + $0x18] sm:$0xff] %vm733_vm4, %v1726_v13 }
0x1813   :  { %v3563_v53 = vpop.eup %3562 }
0x1814   :  { %v2382_v48 = vmul.f32 %v3563_v53, %v3555_v39 }
0x1816   :  { %2796 = vst.msk [vmem:[%s4359_s12 + $0x28] sm:$0xff] %vm733_vm4, %v2382_v48 }
0x1817   :  { %3721 = shalt.err (!%p3718_p1)
}
0x1818   :  { %s3722_s14 = scalar_lea.hbm %s4360_s13, 896 }
0x1819   :  { %p3723_p2 = scmp.ne.s32.totalorder %s4360_s13, %s3722_s14  ;;  %p3726_p3 = scmp.lt.u32.totalorder %s3722_s14, %s4360_s13 }
0x181b   :  { %p3728_p4 = pnand %p3726_p3, %p3723_p2 }
0x181d   :  { %3731 = shalt.err (!%p3728_p4)
}
0x181e   :  { %2728 = dma.vmem_to_hbm [thread:$0]  %s2723_s7, 896, %s4360_s13, [#allocation6], %s3748_s29, %s3748_s29, %s3749_s30  }
0x189a   :  { %v2708_v52 = vpop.xlane.xlu1 %2707 }
0x189b   :  { %3564 = vrcp.f32 %v2708_v52 }
0x18a5   :  { %v3565_v54 = vpop.eup %3564 }
0x18a6   :  { %v2710_v55 = vmul.f32 %v3565_v54, %v3557_v45 }
0x18a8   :  { %2803 = vst.msk [vmem:[%s4359_s12 + $0x30] sm:$0xff] %vm733_vm4, %v2710_v55 }
0x18a9   :  { %3742 = dma.done.wait [#allocation6], 896  }
0x18aa   :  { %3743 = vsyncadd [#allocation6], 4294966400 }
0x18ab   :  { %2734 = vsyncpa [#allocation5], 1 }
0x18ac   :  { %2735 = vsyncpa [#allocation10], 1 }
0x18ad   :  { %2736 = vsyncpa [#allocation13], 1 }
0x18ae   :  { %2737 = vsyncpa [#allocation16], 1 }
0x18af   :  { %2738 = vsyncpa [#allocation6], 1 }
0x18b0   :  { %2739 = vsyncpa [#allocation7], 1 }

</bundles_post_ra>
